<compile_context>
chip_gen: v5e
topology: v5e:2x2
jax: 0.10.0
libtpu: 0.0.40
codegen_flags: <defaults>
</compile_context>

<pallas_src>
import functools

import jax
import jax.numpy as jnp
from jax import lax
from jax.experimental import pallas as pl
from jax.experimental.pallas import tpu as pltpu

THRESHOLD1 = 0.6
THRESHOLD2 = 0.995


# ----------------------------------------------------------------------------
# Fused kernel: similarity matmul -> augmentation -> gcn_norm -> 2-layer GCN.
# Whole arrays are single VMEM blocks (adequate for the node-classification graph
# sizes this model targets; row-tiling with a two-pass degree normalization would
# be needed for N much larger than ~2k).
# ----------------------------------------------------------------------------
def saug_gcn_fused_kernel(zcat_ref, adjt_ref, attr_ref, w1t_ref, w2t_ref, b2_ref,
                          out_ref, p_ref, logits_ref, *, num_weights, t1, t2):
    # ---- SimAug similarity: one deep (K*D) contraction on the MXU ----------
    zcat = zcat_ref[...]                                          # (N, K*D)
    logits = jnp.dot(zcat, zcat.T,
                     preferred_element_type=jnp.float32) * (1.0 / num_weights)
    logits_ref[...] = logits

    # ---- edge augmentation + gcn_norm --------------------------------------
    # adjt_ref holds A^T (built in the wrapper). logits is exactly symmetric
    # (same products, same accumulation order), so the get_aug_edge_idx masks can
    # be applied directly in the transposed layout: no in-kernel N x N transpose.
    adjt = adjt_ref[...]
    keep = jnp.logical_and(adjt > 0.0, logits > t1)               # surviving original edges
    add = logits > t2                                             # newly added edges
    a_hat = jnp.where(jnp.logical_or(keep, add), 1.0, 0.0)        # = A_aug^T
    n = a_hat.shape[0]
    row = lax.broadcasted_iota(jnp.int32, (n, n), 0)
    col = lax.broadcasted_iota(jnp.int32, (n, n), 1)
    a_hat = jnp.where(row == col, 1.0, a_hat)                     # add_remaining_self_loops
    deg = jnp.sum(a_hat, axis=1, keepdims=True)                   # in-degree, (N, 1)
    dinv = jnp.where(deg > 0.0, lax.rsqrt(deg), 0.0)              # EUP rsqrt
    p = (a_hat * dinv) * jnp.transpose(dinv)                      # D^-1/2 A_hat D^-1/2
    p_ref[...] = p

    # ---- fused 2-layer GCN: H never leaves VMEM -----------------------------
    xw1 = jnp.dot(attr_ref[...], w1t_ref[...], preferred_element_type=jnp.float32)
    h = jnp.maximum(jnp.dot(p, xw1, preferred_element_type=jnp.float32), 0.0)
    # F.dropout(p=0.5, training=False) is the identity (eval mode)
    hw2 = jnp.dot(h, w2t_ref[...], preferred_element_type=jnp.float32)
    out = jnp.dot(p, hw2, preferred_element_type=jnp.float32) + b2_ref[...]
    out_ref[...] = out.astype(out_ref.dtype)


# ----------------------------------------------------------------------------
# Wrapper: sparse -> dense glue + Z slab construction (O(N*K*D), negligible),
# then one fused pallas_call for all the N^2 work.
# ----------------------------------------------------------------------------
def saug_gcn_forward(attr_idx, edge_idx, n, d, params, t1=THRESHOLD1, t2=THRESHOLD2):
    w_sim = params["w_sim"]
    k = w_sim.shape[0]
    hidden = params["w1"].shape[0]
    classes = params["w2"].shape[0]

    # sparse COO -> dense (matches torch.sparse.FloatTensor(...).to_dense(), values = 1)
    attr_dense = jnp.zeros((n, d), jnp.float32).at[attr_idx[0], attr_idx[1]].set(1.0)
    # adjacency stored pre-transposed: adjt[dst, src] = 1 (avoids in-kernel transpose)
    adjt_dense = jnp.zeros((n, n), jnp.float32).at[edge_idx[1], edge_idx[0]].set(1.0)

    # Z = F.normalize(attr[None] * w_sim[:, None], p=2, dim=-1), laid out as (N, K*D)
    # so the kernel's similarity matmul has contraction depth K*D (fills the MXU).
    aw = attr_dense[None, :, :] * w_sim[:, None, :]                       # (K, N, D)
    ssq = jnp.sum(aw * aw, axis=-1, keepdims=True)
    z = aw * lax.rsqrt(jnp.maximum(ssq, 1e-24))                           # == aw / max(||aw||, 1e-12)
    zcat = jnp.transpose(z, (1, 0, 2)).reshape(n, k * d)                  # (N, K*D)

    w1t = params["w1"].T                           # (d, hidden)   conv1.lin.weight^T (no bias)
    w2t = params["w2"].T                           # (hidden, classes)
    b2 = params["b2"].reshape(1, classes)

    nn_bytes = n * n * 4
    vmem_limit = int(min(100 * 2**20, max(32 * 2**20, 16 * nn_bytes)))

    out, p, logits = pl.pallas_call(
        functools.partial(saug_gcn_fused_kernel, num_weights=k, t1=t1, t2=t2),
        out_shape=(jax.ShapeDtypeStruct((n, classes), jnp.float32),
                   jax.ShapeDtypeStruct((n, n), jnp.float32),
                   jax.ShapeDtypeStruct((n, n), jnp.float32)),
        grid_spec=pltpu.PrefetchScalarGridSpec(
            num_scalar_prefetch=0,
            grid=(1,),
            in_specs=[pl.BlockSpec((n, k * d), lambda i: (0, 0)),
                      pl.BlockSpec((n, n), lambda i: (0, 0)),
                      pl.BlockSpec((n, d), lambda i: (0, 0)),
                      pl.BlockSpec((d, hidden), lambda i: (0, 0)),
                      pl.BlockSpec((hidden, classes), lambda i: (0, 0)),
                      pl.BlockSpec((1, classes), lambda i: (0, 0))],
            out_specs=[pl.BlockSpec((n, classes), lambda i: (0, 0)),
                       pl.BlockSpec((n, n), lambda i: (0, 0)),
                       pl.BlockSpec((n, n), lambda i: (0, 0))]),
        compiler_params=pltpu.CompilerParams(
            dimension_semantics=("arbitrary",),
            vmem_limit_bytes=vmem_limit),
    )(zcat, adjt_dense, attr_dense, w1t, w2t, b2)
    return out, p, logits, attr_dense, adjt_dense


# ----------------------------------------------------------------------------
# Pure-JAX references for sanity checks.
# ----------------------------------------------------------------------------
def reference_logits(attr_dense, w_sim):
    aw = attr_dense[None] * w_sim[:, None, :]
    nrm = jnp.sqrt(jnp.sum(aw * aw, axis=-1, keepdims=True))
    z = aw / jnp.maximum(nrm, 1e-12)
    return jnp.einsum("knd,kmd->nm", z, z, precision="highest") / w_sim.shape[0]


def reference_p(logits, adjt_dense, t1, t2):
    n = adjt_dense.shape[0]
    adj = adjt_dense.T                      # untransposed adjacency (src, dst)
    aug = (((adj > 0) & (logits > t1)) | (logits > t2)).astype(jnp.float32)
    a_hat = aug.T.at[jnp.diag_indices(n)].set(1.0)
    deg = a_hat.sum(1)
    dinv = jnp.where(deg > 0, 1.0 / jnp.sqrt(deg), 0.0)
    return dinv[:, None] * a_hat * dinv[None, :]


def reference_out(p, attr_dense, w1, w2, b2):
    mm = functools.partial(jnp.matmul, precision="highest")
    h = jnp.maximum(mm(p, mm(attr_dense, w1.T)), 0.0)
    return mm(p, mm(h, w2.T)) + b2


def glorot(key, shape):
    fan_out, fan_in = shape
    limit = (6.0 / (fan_in + fan_out)) ** 0.5
    return jax.random.uniform(key, shape, jnp.float32, -limit, limit)


if __name__ == "__main__":
    # small synthetic problem
    N, D = 128, 64          # nodes, features
    HIDDEN, CLASSES = 32, 8
    NUM_WEIGHTS = 4

    key = jax.random.PRNGKey(0)
    k_attr, k_edge, k_ws, k_w1, k_w2, k_b2 = jax.random.split(key, 6)

    # sparse attribute / edge index inputs (unique entries, values = 1)
    flat_a = jax.random.choice(k_attr, N * D, (N * D // 8,), replace=False)
    attr_idx = jnp.stack([flat_a // D, flat_a % D]).astype(jnp.int32)
    flat_e = jax.random.choice(k_edge, N * N, (N * 6,), replace=False)
    edge_idx = jnp.stack([flat_e // N, flat_e % N]).astype(jnp.int32)

    # deterministic parameter init (shapes from the module __init__)
    params = {
        "w_sim": glorot(k_ws, (NUM_WEIGHTS, D)),               # SimAug.weight_tensor
        "w1": glorot(k_w1, (HIDDEN, D)),                       # conv1.lin.weight (no bias used)
        "w2": glorot(k_w2, (CLASSES, HIDDEN)),                 # conv2.lin.weight
        "b2": 0.1 * jax.random.normal(k_b2, (CLASSES,), jnp.float32),  # conv2.bias
    }

    out, p, logits, attr_dense, adjt_dense = saug_gcn_forward(attr_idx, edge_idx, N, D, params)
    out = jax.block_until_ready(out)

    # sanity checks against pure-JAX reference
    ref_logits = reference_logits(attr_dense, params["w_sim"])
    assert bool(jnp.allclose(logits, ref_logits, rtol=2e-2, atol=2e-3)), "logits mismatch"
    # reuse kernel logits for thresholding so the check is not boundary-sensitive
    ref_p = reference_p(logits, adjt_dense, THRESHOLD1, THRESHOLD2)
    assert bool(jnp.allclose(p, ref_p, rtol=1e-4, atol=1e-5)), "propagation matrix mismatch"
    ref_out = reference_out(p, attr_dense, params["w1"], params["w2"], params["b2"])
    assert bool(jnp.allclose(out, ref_out, rtol=2e-2, atol=2e-3)), "GCN output mismatch"
    assert out.shape == (N, CLASSES) and bool(jnp.all(jnp.isfinite(out)))

    print("KERNEL_OK")
</pallas_src>

<mosaic_0001>
module attributes {stable_mosaic.version = 11 : i64} {
  func.func @saug_gcn_fused_kernel(%arg0: i32, %arg1: memref<128x256xf32, #tpu.memory_space<vmem>>, %arg2: memref<128x128xf32, #tpu.memory_space<vmem>>, %arg3: memref<128x64xf32, #tpu.memory_space<vmem>>, %arg4: memref<64x32xf32, #tpu.memory_space<vmem>>, %arg5: memref<32x8xf32, #tpu.memory_space<vmem>>, %arg6: memref<1x8xf32, #tpu.memory_space<vmem>>, %arg7: memref<128x8xf32, #tpu.memory_space<vmem>>, %arg8: memref<128x128xf32, #tpu.memory_space<vmem>>, %arg9: memref<128x128xf32, #tpu.memory_space<vmem>>) attributes {dimension_semantics = [#tpu.dimension_semantics<arbitrary>], iteration_bounds = array<i64: 1>, scalar_prefetch = 0 : i64, scratch_operands = 0 : i64, tpu.core_type = #tpu.core_type<tc>, window_params = [{pipeline_mode = #tpu.pipeline_mode<synchronous>, transform_indices = @transform_0, window_bounds = array<i64: 128, 256>}, {pipeline_mode = #tpu.pipeline_mode<synchronous>, transform_indices = @transform_1, window_bounds = array<i64: 128, 128>}, {pipeline_mode = #tpu.pipeline_mode<synchronous>, transform_indices = @transform_2, window_bounds = array<i64: 128, 64>}, {pipeline_mode = #tpu.pipeline_mode<synchronous>, transform_indices = @transform_3, window_bounds = array<i64: 64, 32>}, {pipeline_mode = #tpu.pipeline_mode<synchronous>, transform_indices = @transform_4, window_bounds = array<i64: 32, 8>}, {pipeline_mode = #tpu.pipeline_mode<synchronous>, transform_indices = @transform_5, window_bounds = array<i64: 1, 8>}, {pipeline_mode = #tpu.pipeline_mode<synchronous>, transform_indices = @transform_6, window_bounds = array<i64: 128, 8>}, {pipeline_mode = #tpu.pipeline_mode<synchronous>, transform_indices = @transform_7, window_bounds = array<i64: 128, 128>}, {pipeline_mode = #tpu.pipeline_mode<synchronous>, transform_indices = @transform_8, window_bounds = array<i64: 128, 128>}]} {
    %c0 = arith.constant 0 : index
    %c0_0 = arith.constant 0 : index
    %0 = vector.load %arg1[%c0, %c0_0] : memref<128x256xf32, #tpu.memory_space<vmem>>, vector<128x256xf32>
    %1 = tpu.transpose %0, [1, 0] : vector<128x256xf32> -> vector<256x128xf32>
    %cst = arith.constant dense<0.000000e+00> : vector<128x128xf32>
    %2 = tpu.matmul %0, %1, %cst {dimension_numbers = #tpu.dot_dimension_numbers<[1], [0], [0], [1], [0, 0, 1, 1], [], []>} : vector<128x256xf32>, vector<256x128xf32>, vector<128x128xf32> -> vector<128x128xf32>
    %cst_1 = arith.constant 2.500000e-01 : f32
    %3 = vector.broadcast %cst_1 : f32 to vector<128x128xf32>
    %4 = arith.mulf %2, %3 : vector<128x128xf32>
    %c0_2 = arith.constant 0 : index
    %c0_3 = arith.constant 0 : index
    %5 = vector.load %arg9[%c0_2, %c0_3] : memref<128x128xf32, #tpu.memory_space<vmem>>, vector<128x128xf32>
    tpu.vector_store %arg9[%c0_2, %c0_3], %4 {strides = array<i32>} : memref<128x128xf32, #tpu.memory_space<vmem>>, vector<128x128xf32>,
    %c0_4 = arith.constant 0 : index
    %c0_5 = arith.constant 0 : index
    %6 = vector.load %arg2[%c0_4, %c0_5] : memref<128x128xf32, #tpu.memory_space<vmem>>, vector<128x128xf32>
    %cst_6 = arith.constant 0.000000e+00 : f32
    %7 = vector.broadcast %cst_6 : f32 to vector<128x128xf32>
    %8 = arith.cmpf ogt, %6, %7 : vector<128x128xf32>
    %cst_7 = arith.constant 6.000000e-01 : f32
    %9 = vector.broadcast %cst_7 : f32 to vector<128x128xf32>
    %10 = arith.cmpf ogt, %4, %9 : vector<128x128xf32>
    %11 = arith.andi %8, %10 : vector<128x128xi1>
    %cst_8 = arith.constant 9.950000e-01 : f32
    %12 = vector.broadcast %cst_8 : f32 to vector<128x128xf32>
    %13 = arith.cmpf ogt, %4, %12 : vector<128x128xf32>
    %14 = arith.ori %11, %13 : vector<128x128xi1>
    %cst_9 = arith.constant 1.000000e+00 : f32
    %cst_10 = arith.constant 0.000000e+00 : f32
    %15 = vector.broadcast %cst_9 : f32 to vector<128x128xf32>
    %16 = vector.broadcast %cst_10 : f32 to vector<128x128xf32>
    %17 = arith.select %14, %15, %16 : vector<128x128xi1>, vector<128x128xf32>
    %18 = tpu.iota {dimensions = array<i32: 0>} : vector<128x128xi32>
    %19 = tpu.iota {dimensions = array<i32: 1>} : vector<128x128xi32>
    %20 = arith.cmpi eq, %18, %19 : vector<128x128xi32>
    %cst_11 = arith.constant 1.000000e+00 : f32
    %21 = vector.broadcast %cst_11 : f32 to vector<128x128xf32>
    %22 = arith.select %20, %21, %17 : vector<128x128xi1>, vector<128x128xf32>
    %cst_12 = arith.constant dense<0.000000e+00> : vector<128xf32>
    %23 = vector.multi_reduction <add>, %22, %cst_12 [1] : vector<128x128xf32> to vector<128xf32>
    %24 = vector.shape_cast %23 : vector<128xf32> to vector<128x1xf32>
    %cst_13 = arith.constant 0.000000e+00 : f32
    %25 = vector.broadcast %cst_13 : f32 to vector<128x1xf32>
    %26 = arith.cmpf ogt, %24, %25 : vector<128x1xf32>
    %27 = math.rsqrt %24 : vector<128x1xf32>
    %cst_14 = arith.constant 0.000000e+00 : f32
    %28 = vector.broadcast %cst_14 : f32 to vector<128x1xf32>
    %29 = arith.select %26, %27, %28 : vector<128x1xi1>, vector<128x1xf32>
    %30 = vector.broadcast %29 : vector<128x1xf32> to vector<128x128xf32>
    %31 = arith.mulf %22, %30 : vector<128x128xf32>
    %32 = tpu.transpose %29, [1, 0] : vector<128x1xf32> -> vector<1x128xf32>
    %33 = vector.broadcast %32 : vector<1x128xf32> to vector<128x128xf32>
    %34 = arith.mulf %31, %33 : vector<128x128xf32>
    %c0_15 = arith.constant 0 : index
    %c0_16 = arith.constant 0 : index
    %35 = vector.load %arg8[%c0_15, %c0_16] : memref<128x128xf32, #tpu.memory_space<vmem>>, vector<128x128xf32>
    tpu.vector_store %arg8[%c0_15, %c0_16], %34 {strides = array<i32>} : memref<128x128xf32, #tpu.memory_space<vmem>>, vector<128x128xf32>,
    %c0_17 = arith.constant 0 : index
    %c0_18 = arith.constant 0 : index
    %36 = vector.load %arg3[%c0_17, %c0_18] : memref<128x64xf32, #tpu.memory_space<vmem>>, vector<128x64xf32>
    %c0_19 = arith.constant 0 : index
    %c0_20 = arith.constant 0 : index
    %37 = vector.load %arg4[%c0_19, %c0_20] : memref<64x32xf32, #tpu.memory_space<vmem>>, vector<64x32xf32>
    %cst_21 = arith.constant dense<0.000000e+00> : vector<128x32xf32>
    %38 = tpu.matmul %36, %37, %cst_21 {dimension_numbers = #tpu.dot_dimension_numbers<[1], [0], [0], [1], [0, 0, 1, 1], [], []>} : vector<128x64xf32>, vector<64x32xf32>, vector<128x32xf32> -> vector<128x32xf32>
    %cst_22 = arith.constant dense<0.000000e+00> : vector<128x32xf32>
    %39 = tpu.matmul %34, %38, %cst_22 {dimension_numbers = #tpu.dot_dimension_numbers<[1], [0], [0], [1], [0, 0, 1, 1], [], []>} : vector<128x128xf32>, vector<128x32xf32>, vector<128x32xf32> -> vector<128x32xf32>
    %cst_23 = arith.constant 0.000000e+00 : f32
    %40 = vector.broadcast %cst_23 : f32 to vector<128x32xf32>
    %41 = arith.maximumf %39, %40 : vector<128x32xf32>
    %c0_24 = arith.constant 0 : index
    %c0_25 = arith.constant 0 : index
    %42 = vector.load %arg5[%c0_24, %c0_25] : memref<32x8xf32, #tpu.memory_space<vmem>>, vector<32x8xf32>
    %cst_26 = arith.constant dense<0.000000e+00> : vector<128x8xf32>
    %43 = tpu.matmul %41, %42, %cst_26 {dimension_numbers = #tpu.dot_dimension_numbers<[1], [0], [0], [1], [0, 0, 1, 1], [], []>} : vector<128x32xf32>, vector<32x8xf32>, vector<128x8xf32> -> vector<128x8xf32>
    %cst_27 = arith.constant dense<0.000000e+00> : vector<128x8xf32>
    %44 = tpu.matmul %34, %43, %cst_27 {dimension_numbers = #tpu.dot_dimension_numbers<[1], [0], [0], [1], [0, 0, 1, 1], [], []>} : vector<128x128xf32>, vector<128x8xf32>, vector<128x8xf32> -> vector<128x8xf32>
    %c0_28 = arith.constant 0 : index
    %c0_29 = arith.constant 0 : index
    %45 = vector.load %arg6[%c0_28, %c0_29] : memref<1x8xf32, #tpu.memory_space<vmem>>, vector<1x8xf32>
    %46 = vector.broadcast %45 : vector<1x8xf32> to vector<128x8xf32>
    %47 = arith.addf %44, %46 : vector<128x8xf32>
    %c0_30 = arith.constant 0 : index
    %c0_31 = arith.constant 0 : index
    %48 = vector.load %arg7[%c0_30, %c0_31] : memref<128x8xf32, #tpu.memory_space<vmem>>, vector<128x8xf32>
    tpu.vector_store %arg7[%c0_30, %c0_31], %47 {strides = array<i32>} : memref<128x8xf32, #tpu.memory_space<vmem>>, vector<128x8xf32>,
    return
  }
  func.func @transform_0(%arg0: i32) -> (i32, i32) {
    %c0_i32 = arith.constant 0 : i32
    %c0_i32_0 = arith.constant 0 : i32
    %c0_i32_1 = arith.constant 0 : i32
    return %c0_i32, %c0_i32_0 : i32, i32
  }
  func.func @transform_1(%arg0: i32) -> (i32, i32) {
    %c0_i32 = arith.constant 0 : i32
    %c0_i32_0 = arith.constant 0 : i32
    %c0_i32_1 = arith.constant 0 : i32
    return %c0_i32, %c0_i32_0 : i32, i32
  }
  func.func @transform_2(%arg0: i32) -> (i32, i32) {
    %c0_i32 = arith.constant 0 : i32
    %c0_i32_0 = arith.constant 0 : i32
    %c0_i32_1 = arith.constant 0 : i32
    return %c0_i32, %c0_i32_0 : i32, i32
  }
  func.func @transform_3(%arg0: i32) -> (i32, i32) {
    %c0_i32 = arith.constant 0 : i32
    %c0_i32_0 = arith.constant 0 : i32
    %c0_i32_1 = arith.constant 0 : i32
    return %c0_i32, %c0_i32_0 : i32, i32
  }
  func.func @transform_4(%arg0: i32) -> (i32, i32) {
    %c0_i32 = arith.constant 0 : i32
    %c0_i32_0 = arith.constant 0 : i32
    %c0_i32_1 = arith.constant 0 : i32
    return %c0_i32, %c0_i32_0 : i32, i32
  }
  func.func @transform_5(%arg0: i32) -> (i32, i32) {
    %c0_i32 = arith.constant 0 : i32
    %c0_i32_0 = arith.constant 0 : i32
    %c0_i32_1 = arith.constant 0 : i32
    return %c0_i32, %c0_i32_0 : i32, i32
  }
  func.func @transform_6(%arg0: i32) -> (i32, i32) {
    %c0_i32 = arith.constant 0 : i32
    %c0_i32_0 = arith.constant 0 : i32
    %c0_i32_1 = arith.constant 0 : i32
    return %c0_i32, %c0_i32_0 : i32, i32
  }
  func.func @transform_7(%arg0: i32) -> (i32, i32) {
    %c0_i32 = arith.constant 0 : i32
    %c0_i32_0 = arith.constant 0 : i32
    %c0_i32_1 = arith.constant 0 : i32
    return %c0_i32, %c0_i32_0 : i32, i32
  }
  func.func @transform_8(%arg0: i32) -> (i32, i32) {
    %c0_i32 = arith.constant 0 : i32
    %c0_i32_0 = arith.constant 0 : i32
    %c0_i32_1 = arith.constant 0 : i32
    return %c0_i32, %c0_i32_0 : i32, i32
  }
}

</mosaic_0001>

<bundles_post_ra>
// kernel: tpu_custom_call.1
= control target key start
LH: loop header
LB: loop body
LE: loop exit
PB: predicated region body
PF: predicated region fallthrough
CT: control target
= control target key end

     0   :  { %14 = vsyncpa [#allocation3], 0  ;;  %s2078_s0 = inlined_call_operand.hbm [shape: f32[128,256], index: 0, kind: input, shape index: {}]   ;;  %s2079_s1 = inlined_call_operand.vmem [shape: f32[128,128], index: 1, kind: input, shape index: {}]   ;;  %s2080_s2 = inlined_call_operand.vmem [shape: f32[128,64], index: 2, kind: input, shape index: {}]   ;;  %s2081_s3 = inlined_call_operand.vmem [shape: f32[64,32], index: 3, kind: input, shape index: {}]   ;;  %s2082_s4 = inlined_call_operand.vmem [shape: f32[32,8], index: 4, kind: input, shape index: {}]   ;;  %s2083_s5 = inlined_call_operand.vmem [shape: f32[1,8], index: 5, kind: input, shape index: {}]   ;;  %s2084_s6 = inlined_call_operand.vmem [shape: f32[128,8], index: 6, kind: output, shape index: {0}]   ;;  %s2085_s7 = inlined_call_operand.hbm [shape: f32[128,128], index: 7, kind: output, shape index: {1}]   ;;  %s2086_s8 = inlined_call_operand.hbm [shape: f32[128,128], index: 8, kind: output, shape index: {2}]  }
   0x1   :  { %15 = vsyncpa [#allocation4], 0 }
   0x2   :  { %16 = vsyncpa [#allocation7], 0  ;;  %s21_s29 = sshll.u32 %s2078_s0, 4  ;;  %s1345_s30 = smov [#allocation2]   ;;  %s22_s29 = int_to_ptr.hbm [resolvable:$true] %s21_s29 }
   0x3   :  { %s23_s9 = sshll.u32 %s1345_s30, 4  ;;  %s1346_s10 = smov 256   ;;  %s24_s9 = int_to_ptr.vmem [resolvable:$true] %s23_s9 }
   0x4   :  { %s1347_s11 = smov 16  }
   0x5   :  { %29 = dma.hbm_to_vmem [thread:$0]  %s22_s29, 4096, %s24_s9, [#allocation3], %s1346_s10, %s1346_s10, %s1347_s11  }
   0x6   :  { %1339 = dma.done.wait [#allocation3], 4096  }
   0x7   :  { %1340 = vsyncadd [#allocation3], 4294963200  ;;  %v1401_v0 = vld [vmem:[#allocation2 + $0xf0] sm:$0xff]  ;;  %v1403_v1 = vld [vmem:[#allocation2 + $0xf8] sm:$0xff]  ;;  %vm730_vm0 = vcmask 523264   ;;  %v350_v52 = vlaneseq  ;;  %v1348_v62 = vmov 0.0  }
   0x8   :  { %76 = vmatpush.xpose.msra.mxu0 %v1401_v0  ;;  %141 = vmatpush.xpose.msra.mxu1 %v1403_v1  ;;  %v1407_v2 = vld [vmem:[#allocation2 + $0xe0] sm:$0xff]  ;;  %v1409_v3 = vld [vmem:[#allocation2 + $0xe8] sm:$0xff]  ;;  %v1413_v4 = vld [vmem:[#allocation2 + $0xd0] sm:$0xff]  ;;  %s1137_s26 = sshll.u32 %s2085_s7, 4  ;;  %s1349_s27 = smov [#allocation5]   ;;  %s1138_s26 = int_to_ptr.hbm [resolvable:$true] %s1137_s26 }
   0x9   :  { %v1415_v5 = vld [vmem:[#allocation2 + $0xd8] sm:$0xff]  ;;  %v1419_v6 = vld [vmem:[#allocation2 + $0xc0] sm:$0xff]  ;;  %v1421_v7 = vld [vmem:[#allocation2 + $0xc8] sm:$0xff]  ;;  %v1560_v57 = vshrl.u32 %v350_v52, 7  ;;  %v1562_v58 = vand.u32 127, %v350_v52  ;;  %s1135_s28 = sshll.u32 %s1349_s27, 4  ;;  %s1136_s28 = int_to_ptr.vmem [resolvable:$true] %s1135_s28 }
   0xa   :  { %v1425_v8 = vld [vmem:[#allocation2 + $0xb0] sm:$0xff]  ;;  %v1427_v9 = vld [vmem:[#allocation2 + $0xb8] sm:$0xff]  ;;  %v1431_v10 = vld [vmem:[#allocation2 + $0xa0] sm:$0xff]  ;;  %s1351_s9 = smov 8   ;;  %s1352_s10 = smov [#allocation6]  }
   0xb   :  { %v1433_v11 = vld [vmem:[#allocation2 + $0xa8] sm:$0xff]  ;;  %v1437_v12 = vld [vmem:[#allocation2 + $0x90] sm:$0xff]  ;;  %v1439_v13 = vld [vmem:[#allocation2 + $0x98] sm:$0xff]  ;;  %vm369_vm5 = vcmp.eq.s32.totalorder %v1560_v57, %v1562_v58  ;;  %s1148_s11 = sshll.u32 %s1352_s10, 4  ;;  %s1149_s11 = int_to_ptr.vmem [resolvable:$true] %s1148_s11 }
   0xc   :  { %77 = vmatpush.xpose.msra.mxu0 %v1407_v2  ;;  %142 = vmatpush.xpose.msra.mxu1 %v1409_v3  ;;  %v1443_v14 = vld [vmem:[#allocation2 + $0x80] sm:$0xff]  ;;  %v1445_v15 = vld [vmem:[#allocation2 + $0x88] sm:$0xff]  ;;  %v1449_v16 = vld [vmem:[#allocation2 + $0x70] sm:$0xff] }
   0xd   :  { %v1451_v17 = vld [vmem:[#allocation2 + $0x78] sm:$0xff]  ;;  %v1455_v18 = vld [vmem:[#allocation2 + $0x60] sm:$0xff]  ;;  %v1457_v19 = vld [vmem:[#allocation2 + $0x68] sm:$0xff] }
   0xe   :  { %v1461_v20 = vld [vmem:[#allocation2 + $0x50] sm:$0xff]  ;;  %v55_v21 = vld [vmem:[#allocation2 + $0x58] sm:$0xff]  ;;  %v52_v22 = vld [vmem:[#allocation2 + $0x40] sm:$0xff] }
   0xf   :  { %v53_v23 = vld [vmem:[#allocation2 + $0x48] sm:$0xff]  ;;  %v50_v24 = vld [vmem:[#allocation2 + $0x30] sm:$0xff]  ;;  %v51_v25 = vld [vmem:[#allocation2 + $0x38] sm:$0xff] }
  0x10   :  { %78 = vmatpush.xpose.msra.mxu0 %v1413_v4  ;;  %143 = vmatpush.xpose.msra.mxu1 %v1415_v5  ;;  %v48_v26 = vld [vmem:[#allocation2 + $0x20] sm:$0xff]  ;;  %v49_v27 = vld [vmem:[#allocation2 + $0x28] sm:$0xff]  ;;  %v46_v28 = vld [vmem:[#allocation2 + $0x10] sm:$0xff] }
  0x11   :  { %v47_v29 = vld [vmem:[#allocation2 + $0x18] sm:$0xff]  ;;  %v44_v30 = vld [vmem:[#allocation2] sm:$0xff]  ;;  %v45_v31 = vld [vmem:[#allocation2 + $0x8] sm:$0xff] }
  0x12   :  { %v729_v32 = vld [vmem:[%s2081_s3 + $0x38] sm:$0xff]  ;;  %v728_v33 = vld [vmem:[%s2081_s3 + $0x30] sm:$0xff]  ;;  %v727_v34 = vld [vmem:[%s2081_s3 + $0x28] sm:$0xff] }
  0x13   :  { %1202 = vmatpush.msra.mxu2 %v729_v32  ;;  %v726_v35 = vld [vmem:[%s2081_s3 + $0x20] sm:$0xff]  ;;  %v725_v36 = vld [vmem:[%s2081_s3 + $0x18] sm:$0xff]  ;;  %v724_v37 = vld [vmem:[%s2081_s3 + $0x10] sm:$0xff] }
  0x14   :  { %79 = vmatpush.xpose.msra.mxu0 %v1419_v6  ;;  %144 = vmatpush.xpose.msra.mxu1 %v1421_v7  ;;  %v723_v38 = vld [vmem:[%s2081_s3 + $0x8] sm:$0xff]  ;;  %v722_v39 = vld [vmem:[%s2081_s3] sm:$0xff]  ;;  %v712_v42 = vld [vmem:[%s2080_s2 + $0x30] sm:$0xff]  ;;  %s1350_s3 = smov 128  }
  0x15   :  { %1203 = vmatpush.msra.mxu2 %v728_v33  ;;  %v710_v40 = vld [vmem:[%s2080_s2 + $0x20] sm:$0xff]  ;;  %v711_v41 = vld [vmem:[%s2080_s2 + $0x28] sm:$0xff]  ;;  %v713_v43 = vld [vmem:[%s2080_s2 + $0x38] sm:$0xff] }
  0x16   :  { %v714_v44 = vld [vmem:[%s2080_s2 + $0x40] sm:$0xff]  ;;  %v715_v45 = vld [vmem:[%s2080_s2 + $0x48] sm:$0xff]  ;;  %v716_v46 = vld [vmem:[%s2080_s2 + $0x50] sm:$0xff] }
  0x17   :  { %1204 = vmatpush.msra.mxu2 %v727_v34  ;;  %v717_v47 = vld [vmem:[%s2080_s2 + $0x58] sm:$0xff]  ;;  %v718_v48 = vld [vmem:[%s2080_s2 + $0x60] sm:$0xff]  ;;  %v719_v49 = vld [vmem:[%s2080_s2 + $0x68] sm:$0xff] }
  0x18   :  { %80 = vmatpush.xpose.msra.mxu0 %v1425_v8  ;;  %145 = vmatpush.xpose.msra.mxu1 %v1427_v9  ;;  %v720_v50 = vld [vmem:[%s2080_s2 + $0x70] sm:$0xff]  ;;  %v721_v51 = vld [vmem:[%s2080_s2 + $0x78] sm:$0xff]  ;;  %v238_v55 = vld [vmem:[%s2079_s1] sm:$0xff] }
  0x19   :  { %1205 = vmatpush.msra.mxu2 %v726_v35  ;;  %vm254_vm1 = vcmp.gt.f32.partialorder %v238_v55, 0.0  ;;  %v358_v55 = vadd.s32 56, %v1560_v57 }
  0x1b   :  { %1206 = vmatpush.msra.mxu2 %v725_v36 }
  0x1c   :  { %81 = vmatpush.xpose.msra.mxu0 %v1431_v10  ;;  %146 = vmatpush.xpose.msra.mxu1 %v1433_v11 }
  0x1d   :  { %1207 = vmatpush.msra.mxu2 %v724_v37 }
  0x1f   :  { %1208 = vmatpush.msra.mxu2 %v723_v38 }
  0x20   :  { %82 = vmatpush.xpose.msra.mxu0 %v1437_v12  ;;  %147 = vmatpush.xpose.msra.mxu1 %v1439_v13 }
  0x21   :  { %1209 = vmatpush.msra.mxu2 %v722_v39 }
  0x22   :  { %1174 = vmatmul.msk.f32.vlgmr.msra.gmra.mxu2 %vm730_vm0, %v710_v40 }
  0x24   :  { %83 = vmatpush.xpose.msra.mxu0 %v1443_v14  ;;  %148 = vmatpush.xpose.msra.mxu1 %v1445_v15 }
  0x28   :  { %84 = vmatpush.xpose.msra.mxu0 %v1449_v16  ;;  %149 = vmatpush.xpose.msra.mxu1 %v1451_v17 }
  0x2a   :  { %1175 = vmatmul.msk.f32.gmra.mxu2 %vm730_vm0, %v711_v41 }
  0x2c   :  { %85 = vmatpush.xpose.msra.mxu0 %v1455_v18  ;;  %150 = vmatpush.xpose.msra.mxu1 %v1457_v19 }
  0x30   :  { %86 = vmatpush.xpose.msra.mxu0 %v1461_v20  ;;  %151 = vmatpush.xpose.msra.mxu1 %v55_v21 }
  0x32   :  { %1176 = vmatmul.msk.f32.gmra.mxu2 %vm730_vm0, %v712_v42  ;;  %v244_v42 = vld [vmem:[%s2079_s1 + $0x30] sm:$0xff] }
  0x34   :  { %87 = vmatpush.xpose.msra.mxu0 %v52_v22  ;;  %152 = vmatpush.xpose.msra.mxu1 %v53_v23 }
  0x38   :  { %88 = vmatpush.xpose.msra.mxu0 %v50_v24  ;;  %153 = vmatpush.xpose.msra.mxu1 %v51_v25 }
  0x3a   :  { %1177 = vmatmul.msk.f32.gmra.mxu2 %vm730_vm0, %v713_v43 }
  0x3c   :  { %89 = vmatpush.xpose.msra.mxu0 %v48_v26  ;;  %154 = vmatpush.xpose.msra.mxu1 %v49_v27 }
  0x40   :  { %90 = vmatpush.xpose.msra.mxu0 %v46_v28  ;;  %155 = vmatpush.xpose.msra.mxu1 %v47_v29 }
  0x42   :  { %1178 = vmatmul.msk.f32.gmra.mxu2 %vm730_vm0, %v714_v44 }
  0x44   :  { %91 = vmatpush.xpose.msra.mxu0 %v44_v30  ;;  %156 = vmatpush.xpose.msra.mxu1 %v45_v31 }
  0x47   :  { %92 = vmatmul.f32.vlgmr.msra.gmra.mxu0 %v44_v30  ;;  %157 = vmatmul.f32.vlgmr.msra.gmra.mxu1 %v45_v31 }
  0x48   :  { %787 = vmatpush.msrb.mxu1 %v729_v32 }
  0x4a   :  { %788 = vmatpush.msrb.mxu1 %v728_v33  ;;  %1179 = vmatmul.msk.f32.gmra.mxu2 %vm730_vm0, %v715_v45  ;;  %v243_v33 = vld [vmem:[%s2079_s1 + $0x28] sm:$0xff] }
  0x4c   :  { %789 = vmatpush.msrb.mxu1 %v727_v34 }
  0x4e   :  { %790 = vmatpush.msrb.mxu1 %v726_v35 }
  0x4f   :  { %95 = vmatmul.f32.gmra.mxu0 %v46_v28  ;;  %160 = vmatmul.f32.gmra.mxu1 %v47_v29  ;;  %v355_v28 = vadd.s32 32, %v1560_v57 }
  0x50   :  { %791 = vmatpush.msrb.mxu1 %v725_v36 }
  0x52   :  { %792 = vmatpush.msrb.mxu1 %v724_v37  ;;  %1180 = vmatmul.msk.f32.gmra.mxu2 %vm730_vm0, %v716_v46  ;;  %v356_v37 = vadd.s32 40, %v1560_v57  ;;  %v357_v46 = vadd.s32 48, %v1560_v57 }
  0x54   :  { %793 = vmatpush.msrb.mxu1 %v723_v38 }
  0x56   :  { %794 = vmatpush.msrb.mxu1 %v722_v39 }
  0x57   :  { %98 = vmatmul.f32.gmra.mxu0 %v48_v26  ;;  %163 = vmatmul.f32.gmra.mxu1 %v49_v27 }
  0x5a   :  { %1181 = vmatmul.msk.f32.gmra.mxu2 %vm730_vm0, %v717_v47 }
  0x5f   :  { %101 = vmatmul.f32.gmra.mxu0 %v50_v24  ;;  %166 = vmatmul.f32.gmra.mxu1 %v51_v25  ;;  %v242_v24 = vld [vmem:[%s2079_s1 + $0x20] sm:$0xff] }
  0x62   :  { %1182 = vmatmul.msk.f32.gmra.mxu2 %vm730_vm0, %v718_v48 }
  0x67   :  { %104 = vmatmul.f32.gmra.mxu0 %v52_v22  ;;  %169 = vmatmul.f32.gmra.mxu1 %v53_v23 }
  0x6a   :  { %1183 = vmatmul.msk.f32.gmra.mxu2 %vm730_vm0, %v719_v49 }
  0x6f   :  { %107 = vmatmul.f32.gmra.mxu0 %v1461_v20  ;;  %172 = vmatmul.f32.gmra.mxu1 %v55_v21 }
  0x72   :  { %1184 = vmatmul.msk.f32.gmra.mxu2 %vm730_vm0, %v720_v50 }
  0x77   :  { %110 = vmatmul.f32.gmra.mxu0 %v1455_v18  ;;  %175 = vmatmul.f32.gmra.mxu1 %v1457_v19  ;;  %v354_v19 = vadd.s32 24, %v1560_v57 }
  0x7a   :  { %1185 = vmatmul.msk.f32.gmra.mxu2 %vm730_vm0, %v721_v51  ;;  %v245_v51 = vld [vmem:[%s2079_s1 + $0x38] sm:$0xff] }
  0x7f   :  { %113 = vmatmul.f32.gmra.mxu0 %v1449_v16  ;;  %178 = vmatmul.f32.gmra.mxu1 %v1451_v17  ;;  %v241_v16 = vld [vmem:[%s2079_s1 + $0x18] sm:$0xff] }
  0x87   :  { %116 = vmatmul.f32.gmra.mxu0 %v1443_v14  ;;  %181 = vmatmul.f32.gmra.mxu1 %v1445_v15 }
  0x8f   :  { %119 = vmatmul.f32.gmra.mxu0 %v1437_v12  ;;  %184 = vmatmul.f32.gmra.mxu1 %v1439_v13 }
  0x97   :  { %122 = vmatmul.f32.gmra.mxu0 %v1431_v10  ;;  %187 = vmatmul.f32.gmra.mxu1 %v1433_v11  ;;  %v353_v11 = vadd.s32 16, %v1560_v57 }
  0x9f   :  { %125 = vmatmul.f32.gmra.mxu0 %v1425_v8  ;;  %190 = vmatmul.f32.gmra.mxu1 %v1427_v9  ;;  %v240_v8 = vld [vmem:[%s2079_s1 + $0x10] sm:$0xff] }
  0xa0   :  { %vm256_vm13 = vcmp.gt.f32.partialorder %v240_v8, 0.0 }
  0xa5   :  { %v1599_v27 = vpop.f32.mrf.mxu2 }
  0xa7   :  { %128 = vmatmul.f32.gmra.mxu0 %v1419_v6  ;;  %193 = vmatmul.f32.gmra.mxu1 %v1421_v7 }
  0xad   :  { %v1610_v36 = vpop.f32.mrf.mxu2 }
  0xaf   :  { %131 = vmatmul.f32.gmra.mxu0 %v1413_v4  ;;  %196 = vmatmul.f32.gmra.mxu1 %v1415_v5 }
  0xb5   :  { %v1621_v45 = vpop.f32.mrf.mxu2 }
  0xb7   :  { %134 = vmatmul.f32.gmra.mxu0 %v1407_v2  ;;  %199 = vmatmul.f32.gmra.mxu1 %v1409_v3  ;;  %v352_v3 = vadd.s32 8, %v1560_v57 }
  0xb9   :  { %vm370_vm11 = vcmp.eq.s32.totalorder %v352_v3, %v1562_v58 }
  0xbf   :  { %137 = vmatmul.f32.gmra.mxu0 %v1401_v0  ;;  %202 = vmatmul.f32.gmra.mxu1 %v1403_v1  ;;  %v239_v0 = vld [vmem:[%s2079_s1 + $0x8] sm:$0xff] }
  0xc0   :  { %vm255_vm7 = vcmp.gt.f32.partialorder %v239_v0, 0.0 }
  0xc4   :  { %v93_v53 = vpop.f32.mrf.mxu0  ;;  %v158_v54 = vpop.f32.mrf.mxu1 }
  0xc5   :  { %v159_v56 = vadd.f32 %v158_v54, %v93_v53  ;;  %v1632_v54 = vpop.f32.mrf.mxu2 }
  0xc7   :  { %v206_v59 = vmul.f32 0.25, %v159_v56 }
  0xc9   :  { %222 = vst [vmem:[#allocation6] sm:$0xff] %v206_v59  ;;  %vm270_vm2 = vcmp.gt.f32.partialorder %v206_v59, 0.6  ;;  %vm302_vm3 = vcmp.gt.f32.partialorder %v206_v59, 0.995 }
  0xca   :  { %vm286_vm4 = vmand %vm254_vm1, %vm270_vm2  ;;  %vm371_vm2 = vcmp.eq.s32.totalorder %v353_v11, %v1562_v58 }
  0xcb   :  { %vm318_vm6 = vmor %vm286_vm4, %vm302_vm3  ;;  %vm257_vm4 = vcmp.gt.f32.partialorder %v241_v16, 0.0 }
  0xcc   :  { %v96_v60 = vpop.f32.mrf.mxu0  ;;  %v161_v61 = vpop.f32.mrf.mxu1  ;;  %v334_v63 = vsel %vm318_vm6, 1.0, %v1348_v62 }
  0xcd   :  { %v162_v1 = vadd.f32 %v161_v61, %v96_v60  ;;  %v1570_v2 = vsel %vm369_vm5, 1.0, %v334_v63  ;;  %v246_v63 = vld [vmem:[%s2079_s1 + $0x40] sm:$0xff]  ;;  %v1643_v3 = vpop.f32.mrf.mxu2 }
  0xce   :  { %401 = vadd.xlane.f32.xlu0 %v1570_v2 }
  0xcf   :  { %v207_v4 = vmul.f32 0.25, %v162_v1 }
  0xd1   :  { %223 = vst [vmem:[#allocation6 + $0x8] sm:$0xff] %v207_v4  ;;  %vm271_vm8 = vcmp.gt.f32.partialorder %v207_v4, 0.6  ;;  %vm303_vm9 = vcmp.gt.f32.partialorder %v207_v4, 0.995  ;;  %v359_v4 = vadd.s32 64, %v1560_v57 }
  0xd2   :  { %vm287_vm10 = vmand %vm255_vm7, %vm271_vm8  ;;  %vm372_vm8 = vcmp.eq.s32.totalorder %v354_v19, %v1562_v58 }
  0xd3   :  { %vm319_vm12 = vmor %vm287_vm10, %vm303_vm9  ;;  %vm258_vm10 = vcmp.gt.f32.partialorder %v242_v24, 0.0 }
  0xd4   :  { %v99_v5 = vpop.f32.mrf.mxu0  ;;  %v164_v6 = vpop.f32.mrf.mxu1  ;;  %v335_v7 = vsel %vm319_vm12, 1.0, %v1348_v62 }
  0xd5   :  { %v165_v9 = vadd.f32 %v164_v6, %v99_v5  ;;  %v1579_v10 = vsel %vm370_vm11, 1.0, %v335_v7 }
  0xd6   :  { %403 = vadd.xlane.f32.xlu0 %v1579_v10 }
  0xd7   :  { %v208_v12 = vmul.f32 0.25, %v165_v9  ;;  %v247_v9 = vld [vmem:[%s2079_s1 + $0x48] sm:$0xff] }
  0xd9   :  { %224 = vst [vmem:[#allocation6 + $0x10] sm:$0xff] %v208_v12  ;;  %vm272_vm14 = vcmp.gt.f32.partialorder %v208_v12, 0.6  ;;  %vm304_vm15 = vcmp.gt.f32.partialorder %v208_v12, 0.995 }
  0xda   :  { %vm288_vm1 = vmand %vm256_vm13, %vm272_vm14  ;;  %vm373_vm14 = vcmp.eq.s32.totalorder %v355_v28, %v1562_v58 }
  0xdb   :  { %vm320_vm3 = vmor %vm288_vm1, %vm304_vm15  ;;  %vm259_vm1 = vcmp.gt.f32.partialorder %v243_v33, 0.0 }
  0xdc   :  { %v102_v13 = vpop.f32.mrf.mxu0  ;;  %v167_v14 = vpop.f32.mrf.mxu1  ;;  %v336_v15 = vsel %vm320_vm3, 1.0, %v1348_v62 }
  0xdd   :  { %v168_v17 = vadd.f32 %v167_v14, %v102_v13  ;;  %v1588_v18 = vsel %vm371_vm2, 1.0, %v336_v15  ;;  %v360_v13 = vadd.s32 72, %v1560_v57  ;;  %v1656_v15 = vpop.f32.mrf.mxu2 }
  0xde   :  { %405 = vadd.xlane.f32.xlu1 %v1588_v18 }
  0xdf   :  { %v209_v20 = vmul.f32 0.25, %v168_v17 }
  0xe1   :  { %225 = vst [vmem:[#allocation6 + $0x18] sm:$0xff] %v209_v20  ;;  %vm273_vm5 = vcmp.gt.f32.partialorder %v209_v20, 0.6  ;;  %vm305_vm6 = vcmp.gt.f32.partialorder %v209_v20, 0.995  ;;  %v248_v20 = vld [vmem:[%s2079_s1 + $0x50] sm:$0xff] }
  0xe2   :  { %vm289_vm7 = vmand %vm257_vm4, %vm273_vm5  ;;  %vm374_vm5 = vcmp.eq.s32.totalorder %v356_v37, %v1562_v58 }
  0xe3   :  { %vm321_vm9 = vmor %vm289_vm7, %vm305_vm6  ;;  %vm260_vm7 = vcmp.gt.f32.partialorder %v244_v42, 0.0  ;;  %v250_v42 = vld [vmem:[%s2079_s1 + $0x60] sm:$0xff] }
  0xe4   :  { %v105_v21 = vpop.f32.mrf.mxu0  ;;  %v170_v22 = vpop.f32.mrf.mxu1  ;;  %v337_v23 = vsel %vm321_vm9, 1.0, %v1348_v62 }
  0xe5   :  { %v171_v25 = vadd.f32 %v170_v22, %v105_v21  ;;  %v1597_v26 = vsel %vm372_vm8, 1.0, %v337_v23  ;;  %v361_v23 = vadd.s32 80, %v1560_v57 }
  0xe6   :  { %407 = vadd.xlane.f32.xlu1 %v1597_v26 }
  0xe7   :  { %v210_v29 = vmul.f32 0.25, %v171_v25  ;;  %v1667_v25 = vpop.f32.mrf.mxu2 }
  0xe9   :  { %226 = vst [vmem:[#allocation6 + $0x20] sm:$0xff] %v210_v29  ;;  %vm274_vm11 = vcmp.gt.f32.partialorder %v210_v29, 0.6  ;;  %vm306_vm12 = vcmp.gt.f32.partialorder %v210_v29, 0.995 }
  0xea   :  { %vm290_vm13 = vmand %vm258_vm10, %vm274_vm11  ;;  %vm375_vm11 = vcmp.eq.s32.totalorder %v357_v46, %v1562_v58 }
  0xeb   :  { %vm322_vm15 = vmor %vm290_vm13, %vm306_vm12  ;;  %vm261_vm13 = vcmp.gt.f32.partialorder %v245_v51, 0.0 }
  0xec   :  { %v108_v30 = vpop.f32.mrf.mxu0  ;;  %v173_v31 = vpop.f32.mrf.mxu1  ;;  %v338_v32 = vsel %vm322_vm15, 1.0, %v1348_v62 }
  0xed   :  { %v174_v34 = vadd.f32 %v173_v31, %v108_v30  ;;  %v1608_v35 = vsel %vm373_vm14, 1.0, %v338_v32  ;;  %v249_v31 = vld [vmem:[%s2079_s1 + $0x58] sm:$0xff] }
  0xee   :  { %409 = vadd.xlane.f32.xlu2 %v1608_v35 }
  0xef   :  { %v211_v38 = vmul.f32 0.25, %v174_v34  ;;  %v362_v34 = vadd.s32 88, %v1560_v57 }
  0xf1   :  { %227 = vst [vmem:[#allocation6 + $0x28] sm:$0xff] %v211_v38  ;;  %vm275_vm2 = vcmp.gt.f32.partialorder %v211_v38, 0.6  ;;  %vm307_vm3 = vcmp.gt.f32.partialorder %v211_v38, 0.995  ;;  %v1679_v38 = vpop.f32.mrf.mxu2 }
  0xf2   :  { %vm291_vm4 = vmand %vm259_vm1, %vm275_vm2  ;;  %vm376_vm2 = vcmp.eq.s32.totalorder %v358_v55, %v1562_v58 }
  0xf3   :  { %vm323_vm6 = vmor %vm291_vm4, %vm307_vm3  ;;  %vm262_vm4 = vcmp.gt.f32.partialorder %v246_v63, 0.0 }
  0xf4   :  { %v111_v39 = vpop.f32.mrf.mxu0  ;;  %v176_v40 = vpop.f32.mrf.mxu1  ;;  %v339_v41 = vsel %vm323_vm6, 1.0, %v1348_v62 }
  0xf5   :  { %v177_v43 = vadd.f32 %v176_v40, %v111_v39  ;;  %v1619_v44 = vsel %vm374_vm5, 1.0, %v339_v41 }
  0xf6   :  { %411 = vadd.xlane.f32.xlu2 %v1619_v44 }
  0xf7   :  { %v212_v47 = vmul.f32 0.25, %v177_v43 }
  0xf9   :  { %228 = vst [vmem:[#allocation6 + $0x30] sm:$0xff] %v212_v47  ;;  %vm276_vm8 = vcmp.gt.f32.partialorder %v212_v47, 0.6  ;;  %vm308_vm9 = vcmp.gt.f32.partialorder %v212_v47, 0.995  ;;  %v363_v47 = vadd.s32 96, %v1560_v57 }
  0xfa   :  { %vm292_vm10 = vmand %vm260_vm7, %vm276_vm8  ;;  %vm377_vm8 = vcmp.eq.s32.totalorder %v359_v4, %v1562_v58 }
  0xfb   :  { %vm324_vm12 = vmor %vm292_vm10, %vm308_vm9  ;;  %vm263_vm10 = vcmp.gt.f32.partialorder %v247_v9, 0.0 }
  0xfc   :  { %v114_v48 = vpop.f32.mrf.mxu0  ;;  %v179_v49 = vpop.f32.mrf.mxu1  ;;  %v340_v50 = vsel %vm324_vm12, 1.0, %v1348_v62 }
  0xfd   :  { %v180_v52 = vadd.f32 %v179_v49, %v114_v48  ;;  %v1630_v53 = vsel %vm375_vm11, 1.0, %v340_v50 }
  0xfe   :  { %413 = vadd.xlane.f32.xlu0 %v1630_v53 }
  0xff   :  { %v213_v56 = vmul.f32 0.25, %v180_v52  ;;  %v251_v52 = vld [vmem:[%s2079_s1 + $0x68] sm:$0xff] }
 0x101   :  { %229 = vst [vmem:[#allocation6 + $0x38] sm:$0xff] %v213_v56  ;;  %vm277_vm14 = vcmp.gt.f32.partialorder %v213_v56, 0.6  ;;  %vm309_vm15 = vcmp.gt.f32.partialorder %v213_v56, 0.995 }
 0x102   :  { %vm293_vm1 = vmand %vm261_vm13, %vm277_vm14  ;;  %vm378_vm14 = vcmp.eq.s32.totalorder %v360_v13, %v1562_v58 }
 0x103   :  { %vm325_vm3 = vmor %vm293_vm1, %vm309_vm15  ;;  %vm264_vm1 = vcmp.gt.f32.partialorder %v248_v20, 0.0 }
 0x104   :  { %v117_v59 = vpop.f32.mrf.mxu0  ;;  %v182_v60 = vpop.f32.mrf.mxu1  ;;  %v341_v61 = vsel %vm325_vm3, 1.0, %v1348_v62 }
 0x105   :  { %v183_v0 = vadd.f32 %v182_v60, %v117_v59  ;;  %v1641_v1 = vsel %vm376_vm2, 1.0, %v341_v61  ;;  %v832_v59 = vpop.f32.mrf.mxu2  ;;  %v364_v60 = vadd.s32 104, %v1560_v57 }
 0x106   :  { %415 = vadd.xlane.f32.xlu1 %v1641_v1 }
 0x107   :  { %v214_v5 = vmul.f32 0.25, %v183_v0 }
 0x109   :  { %230 = vst [vmem:[#allocation6 + $0x40] sm:$0xff] %v214_v5  ;;  %vm278_vm5 = vcmp.gt.f32.partialorder %v214_v5, 0.6  ;;  %vm310_vm6 = vcmp.gt.f32.partialorder %v214_v5, 0.995  ;;  %v252_v5 = vld [vmem:[%s2079_s1 + $0x70] sm:$0xff] }
 0x10a   :  { %vm294_vm7 = vmand %vm262_vm4, %vm278_vm5  ;;  %vm379_vm5 = vcmp.eq.s32.totalorder %v361_v23, %v1562_v58  ;;  %v366_v23 = vadd.s32 120, %v1560_v57 }
 0x10b   :  { %vm326_vm9 = vmor %vm294_vm7, %vm310_vm6  ;;  %vm265_vm7 = vcmp.gt.f32.partialorder %v249_v31, 0.0 }
 0x10c   :  { %v120_v6 = vpop.f32.mrf.mxu0  ;;  %v185_v7 = vpop.f32.mrf.mxu1  ;;  %v342_v8 = vsel %vm326_vm9, 1.0, %v1348_v62 }
 0x10d   :  { %v186_v11 = vadd.f32 %v185_v7, %v120_v6  ;;  %v1652_v12 = vsel %vm377_vm8, 1.0, %v342_v8  ;;  %v365_v8 = vadd.s32 112, %v1560_v57  ;;  %v707_v57 = vld [vmem:[%s2080_s2 + $0x8] sm:$0xff] }
 0x10e   :  { %417 = vadd.xlane.f32.xlu2 %v1652_v12 }
 0x10f   :  { %v215_v14 = vmul.f32 0.25, %v186_v11  ;;  %v835_v11 = vpop.f32.mrf.mxu2 }
 0x111   :  { %231 = vst [vmem:[#allocation6 + $0x48] sm:$0xff] %v215_v14  ;;  %vm279_vm11 = vcmp.gt.f32.partialorder %v215_v14, 0.6  ;;  %vm311_vm12 = vcmp.gt.f32.partialorder %v215_v14, 0.995 }
 0x112   :  { %vm295_vm13 = vmand %vm263_vm10, %vm279_vm11  ;;  %vm380_vm11 = vcmp.eq.s32.totalorder %v362_v34, %v1562_v58 }
 0x113   :  { %vm327_vm15 = vmor %vm295_vm13, %vm311_vm12  ;;  %vm266_vm13 = vcmp.gt.f32.partialorder %v250_v42, 0.0 }
 0x114   :  { %v123_v16 = vpop.f32.mrf.mxu0  ;;  %v188_v17 = vpop.f32.mrf.mxu1  ;;  %v343_v19 = vsel %vm327_vm15, 1.0, %v1348_v62 }
 0x115   :  { %v189_v21 = vadd.f32 %v188_v17, %v123_v16  ;;  %v1663_v22 = vsel %vm378_vm14, 1.0, %v343_v19  ;;  %v253_v17 = vld [vmem:[%s2079_s1 + $0x78] sm:$0xff]  ;;  %s1150_s1 = sshll.u32 %s2086_s8, 4  ;;  %s1151_s1 = int_to_ptr.hbm [resolvable:$true] %s1150_s1 }
 0x116   :  { %419 = vadd.xlane.f32.xlu0 %v1663_v22 }
 0x117   :  { %v216_v24 = vmul.f32 0.25, %v189_v21  ;;  %v706_v21 = vld [vmem:[%s2080_s2] sm:$0xff] }
 0x118   :  { %1170 = vmatmul.msk.f32.vlgmr.msrb.gmra.mxu1 %vm730_vm0, %v706_v21 }
 0x119   :  { %232 = vst [vmem:[#allocation6 + $0x50] sm:$0xff] %v216_v24  ;;  %vm280_vm2 = vcmp.gt.f32.partialorder %v216_v24, 0.6  ;;  %vm312_vm3 = vcmp.gt.f32.partialorder %v216_v24, 0.995 }
 0x11a   :  { %vm296_vm4 = vmand %vm264_vm1, %vm280_vm2  ;;  %vm381_vm2 = vcmp.eq.s32.totalorder %v363_v47, %v1562_v58 }
 0x11b   :  { %vm328_vm6 = vmor %vm296_vm4, %vm312_vm3  ;;  %vm267_vm4 = vcmp.gt.f32.partialorder %v251_v52, 0.0 }
 0x11c   :  { %v126_v28 = vpop.f32.mrf.mxu0  ;;  %v191_v29 = vpop.f32.mrf.mxu1  ;;  %v344_v30 = vsel %vm328_vm6, 1.0, %v1348_v62 }
 0x11d   :  { %v192_v32 = vadd.f32 %v191_v29, %v126_v28  ;;  %v1674_v33 = vsel %vm379_vm5, 1.0, %v344_v30  ;;  %v838_v28 = vpop.f32.mrf.mxu2 }
 0x11e   :  { %421 = vadd.xlane.f32.xlu1 %v1674_v33 }
 0x11f   :  { %v217_v37 = vmul.f32 0.25, %v192_v32 }
 0x120   :  { %1171 = vmatmul.msk.f32.gmra.mxu1 %vm730_vm0, %v707_v57 }
 0x121   :  { %233 = vst [vmem:[#allocation6 + $0x58] sm:$0xff] %v217_v37  ;;  %vm281_vm8 = vcmp.gt.f32.partialorder %v217_v37, 0.6  ;;  %vm313_vm9 = vcmp.gt.f32.partialorder %v217_v37, 0.995  ;;  %v709_v37 = vld [vmem:[%s2080_s2 + $0x18] sm:$0xff] }
 0x122   :  { %vm297_vm10 = vmand %vm265_vm7, %vm281_vm8  ;;  %vm382_vm8 = vcmp.eq.s32.totalorder %v364_v60, %v1562_v58 }
 0x123   :  { %vm329_vm12 = vmor %vm297_vm10, %vm313_vm9  ;;  %vm268_vm10 = vcmp.gt.f32.partialorder %v252_v5, 0.0 }
 0x124   :  { %v129_v39 = vpop.f32.mrf.mxu0  ;;  %v194_v40 = vpop.f32.mrf.mxu1  ;;  %v345_v41 = vsel %vm329_vm12, 1.0, %v1348_v62 }
 0x125   :  { %v195_v43 = vadd.f32 %v194_v40, %v129_v39  ;;  %v1685_v46 = vsel %vm380_vm11, 1.0, %v345_v41  ;;  %v841_v31 = vpop.f32.mrf.mxu2 }
 0x126   :  { %423 = vadd.xlane.f32.xlu2 %v1685_v46  ;;  %844 = vmatpush.msrb.mxu0 %v841_v31 }
 0x127   :  { %v218_v48 = vmul.f32 0.25, %v195_v43  ;;  %1210 = vmatpush.msra.mxu3 %v841_v31 }
 0x128   :  { %845 = vmatpush.msrb.mxu0 %v838_v28 }
 0x129   :  { %234 = vst [vmem:[#allocation6 + $0x60] sm:$0xff] %v218_v48  ;;  %vm282_vm14 = vcmp.gt.f32.partialorder %v218_v48, 0.6  ;;  %vm314_vm15 = vcmp.gt.f32.partialorder %v218_v48, 0.995  ;;  %1211 = vmatpush.msra.mxu3 %v838_v28 }
 0x12a   :  { %vm298_vm1 = vmand %vm266_vm13, %vm282_vm14  ;;  %vm383_vm14 = vcmp.eq.s32.totalorder %v365_v8, %v1562_v58  ;;  %846 = vmatpush.msrb.mxu0 %v835_v11 }
 0x12b   :  { %vm330_vm3 = vmor %vm298_vm1, %vm314_vm15  ;;  %vm269_vm1 = vcmp.gt.f32.partialorder %v253_v17, 0.0  ;;  %1212 = vmatpush.msra.mxu3 %v835_v11 }
 0x12c   :  { %v132_v49 = vpop.f32.mrf.mxu0  ;;  %v197_v50 = vpop.f32.mrf.mxu1  ;;  %v346_v51 = vsel %vm330_vm3, 1.0, %v1348_v62  ;;  %847 = vmatpush.msrb.mxu0 %v832_v59 }
 0x12d   :  { %v198_v55 = vadd.f32 %v197_v50, %v132_v49  ;;  %v1694_v56 = vsel %vm381_vm2, 1.0, %v346_v51  ;;  %1213 = vmatpush.msra.mxu3 %v832_v59 }
 0x12e   :  { %425 = vadd.xlane.f32.xlu0 %v1694_v56  ;;  %848 = vmatpush.msrb.mxu0 %v1679_v38 }
 0x12f   :  { %v219_v61 = vmul.f32 0.25, %v198_v55  ;;  %1214 = vmatpush.msra.mxu3 %v1679_v38 }
 0x130   :  { %849 = vmatpush.msrb.mxu0 %v1667_v25 }
 0x131   :  { %235 = vst [vmem:[#allocation6 + $0x68] sm:$0xff] %v219_v61  ;;  %vm283_vm5 = vcmp.gt.f32.partialorder %v219_v61, 0.6  ;;  %vm315_vm6 = vcmp.gt.f32.partialorder %v219_v61, 0.995  ;;  %1215 = vmatpush.msra.mxu3 %v1667_v25 }
 0x132   :  { %vm299_vm7 = vmand %vm267_vm4, %vm283_vm5  ;;  %vm384_vm5 = vcmp.eq.s32.totalorder %v366_v23, %v1562_v58  ;;  %v708_v58 = vld [vmem:[%s2080_s2 + $0x10] sm:$0xff]  ;;  %850 = vmatpush.msrb.mxu0 %v1656_v15 }
 0x133   :  { %vm331_vm9 = vmor %vm299_vm7, %vm315_vm6  ;;  %1172 = vmatmul.msk.f32.gmra.mxu1 %vm730_vm0, %v708_v58  ;;  %1216 = vmatpush.msra.mxu3 %v1656_v15 }
 0x134   :  { %v135_v63 = vpop.f32.mrf.mxu0  ;;  %v200_v0 = vpop.f32.mrf.mxu1  ;;  %v347_v4 = vsel %vm331_vm9, 1.0, %v1348_v62  ;;  %851 = vmatpush.msrb.mxu0 %v1643_v3 }
 0x135   :  { %v201_v6 = vadd.f32 %v200_v0, %v135_v63  ;;  %v1703_v7 = vsel %vm382_vm8, 1.0, %v347_v4  ;;  %1217 = vmatpush.msra.mxu3 %v1643_v3 }
 0x136   :  { %427 = vadd.xlane.f32.xlu1 %v1703_v7  ;;  %852 = vmatpush.msrb.mxu0 %v1632_v54 }
 0x137   :  { %v220_v9 = vmul.f32 0.25, %v201_v6  ;;  %1218 = vmatpush.msra.mxu3 %v1632_v54 }
 0x138   :  { %853 = vmatpush.msrb.mxu0 %v1621_v45 }
 0x139   :  { %236 = vst [vmem:[#allocation6 + $0x70] sm:$0xff] %v220_v9  ;;  %vm284_vm11 = vcmp.gt.f32.partialorder %v220_v9, 0.6  ;;  %vm316_vm12 = vcmp.gt.f32.partialorder %v220_v9, 0.995  ;;  %1219 = vmatpush.msra.mxu3 %v1621_v45 }
 0x13a   :  { %vm300_vm13 = vmand %vm268_vm10, %vm284_vm11  ;;  %854 = vmatpush.msrb.mxu0 %v1610_v36 }
 0x13b   :  { %vm332_vm15 = vmor %vm300_vm13, %vm316_vm12  ;;  %1173 = vmatmul.msk.f32.gmra.mxu1 %vm730_vm0, %v709_v37  ;;  %1220 = vmatpush.msra.mxu3 %v1610_v36 }
 0x13c   :  { %v138_v13 = vpop.f32.mrf.mxu0  ;;  %v203_v14 = vpop.f32.mrf.mxu1  ;;  %v348_v16 = vsel %vm332_vm15, 1.0, %v1348_v62  ;;  %855 = vmatpush.msrb.mxu0 %v1599_v27 }
 0x13d   :  { %v204_v19 = vadd.f32 %v203_v14, %v138_v13  ;;  %v1712_v20 = vsel %vm383_vm14, 1.0, %v348_v16  ;;  %1221 = vmatpush.msra.mxu3 %v1599_v27 }
 0x13e   :  { %429 = vadd.xlane.f32.xlu2 %v1712_v20 }
 0x13f   :  { %v221_v24 = vmul.f32 0.25, %v204_v19 }
 0x141   :  { %237 = vst [vmem:[#allocation6 + $0x78] sm:$0xff] %v221_v24  ;;  %vm285_vm2 = vcmp.gt.f32.partialorder %v221_v24, 0.6  ;;  %vm317_vm3 = vcmp.gt.f32.partialorder %v221_v24, 0.995  ;;  %v402_v32 = vpop.xlane.xlu0 %401 }
 0x142   :  { %vm301_vm4 = vmand %vm269_vm1, %vm285_vm2  ;;  %1235 = vrsqrt.f32 %v402_v32  ;;  %vm455_vm7 = vweird.f32 %v402_v32  ;;  %vm433_vm9 = vcmp.gt.f32.partialorder %v402_v32, 0.0  ;;  %1156 = dma.vmem_to_hbm [thread:$0]  %s1149_s11, 2048, %s1151_s1, [#allocation7], %s1350_s3, %s1350_s3, %s1351_s9  }
 0x143   :  { %vm333_vm6 = vmor %vm301_vm4, %vm317_vm3 }
 0x144   :  { %v349_v29 = vsel %vm333_vm6, 1.0, %v1348_v62 }
 0x145   :  { %v1722_v30 = vsel %vm384_vm5, 1.0, %v349_v29 }
 0x146   :  { %431 = vadd.xlane.f32.xlu0 %v1722_v30 }
 0x148   :  { %v1236_v34 = vpop.eup %1235 }
 0x149   :  { %v404_v62 = vpop.xlane.xlu0 %403  ;;  %v450_v38 = vmul.f32 %v1236_v34, %v402_v32  ;;  %vm456_vm0 = vweird.f32 %v1236_v34 }
 0x14a   :  { %1237 = vrsqrt.f32 %v404_v62  ;;  %vm457_vm8 = vmor %vm455_vm7, %vm456_vm0  ;;  %vm465_vm11 = vweird.f32 %v404_v62  ;;  %vm434_vm13 = vcmp.gt.f32.partialorder %v404_v62, 0.0 }
 0x14b   :  { %v451_v15 = vmul.f32 %v1236_v34, %v450_v38 }
 0x14d   :  { %v452_v3 = vmul.f32 0.5, %v451_v15 }
 0x14f   :  { %v453_v42 = vsub.f32 1.5, %v452_v3 }
 0x150   :  { %v1238_v39 = vpop.eup %1237 }
 0x151   :  { %v406_v25 = vpop.xlane.xlu1 %405  ;;  %v460_v40 = vmul.f32 %v1238_v39, %v404_v62  ;;  %v454_v48 = vmul.f32 %v1236_v34, %v453_v42  ;;  %vm466_vm10 = vweird.f32 %v1238_v39 }
 0x152   :  { %1239 = vrsqrt.f32 %v406_v25  ;;  %vm467_vm12 = vmor %vm465_vm11, %vm466_vm10  ;;  %vm475_vm15 = vweird.f32 %v406_v25  ;;  %vm435_vm2 = vcmp.gt.f32.partialorder %v406_v25, 0.0 }
 0x153   :  { %v461_v41 = vmul.f32 %v1238_v39, %v460_v40  ;;  %v458_v50 = vsel %vm457_vm8, %v1236_v34, %v454_v48 }
 0x154   :  { %v1759_v52 = vsel %vm433_vm9, %v458_v50, 0.0 }
 0x155   :  { %v462_v45 = vmul.f32 0.5, %v461_v41 }
 0x157   :  { %v463_v49 = vsub.f32 1.5, %v462_v45 }
 0x158   :  { %v1240_v43 = vpop.eup %1239 }
 0x159   :  { %v1753_v54 = vpop.xlane.xlu1 %407  ;;  %v470_v47 = vmul.f32 %v1240_v43, %v406_v25  ;;  %v464_v60 = vmul.f32 %v1238_v39, %v463_v49  ;;  %vm476_vm14 = vweird.f32 %v1240_v43 }
 0x15a   :  { %1241 = vrsqrt.f32 %v1753_v54  ;;  %vm477_vm1 = vmor %vm475_vm15, %vm476_vm14  ;;  %vm485_vm4 = vweird.f32 %v1753_v54  ;;  %vm436_vm6 = vcmp.gt.f32.partialorder %v1753_v54, 0.0 }
 0x15b   :  { %v471_v27 = vmul.f32 %v1240_v43, %v470_v47  ;;  %v468_v4 = vsel %vm467_vm12, %v1238_v39, %v464_v60 }
 0x15c   :  { %v1766_v6 = vsel %vm434_vm13, %v468_v4, 0.0 }
 0x15d   :  { %v472_v55 = vmul.f32 0.5, %v471_v27 }
 0x15f   :  { %v473_v61 = vsub.f32 1.5, %v472_v55 }
 0x160   :  { %v1242_v51 = vpop.eup %1241 }
 0x161   :  { %v1756_v36 = vpop.xlane.xlu2 %409  ;;  %v480_v59 = vmul.f32 %v1242_v51, %v1753_v54  ;;  %v474_v11 = vmul.f32 %v1240_v43, %v473_v61  ;;  %vm486_vm3 = vweird.f32 %v1242_v51 }
 0x162   :  { %1243 = vrsqrt.f32 %v1756_v36  ;;  %vm487_vm5 = vmor %vm485_vm4, %vm486_vm3  ;;  %vm495_vm7 = vweird.f32 %v1756_v36  ;;  %vm437_vm9 = vcmp.gt.f32.partialorder %v1756_v36, 0.0 }
 0x163   :  { %v481_v63 = vmul.f32 %v1242_v51, %v480_v59  ;;  %v478_v17 = vsel %vm477_vm1, %v1240_v43, %v474_v11 }
 0x164   :  { %v1773_v21 = vsel %vm435_vm2, %v478_v17, 0.0 }
 0x165   :  { %v482_v8 = vmul.f32 0.5, %v481_v63 }
 0x167   :  { %v483_v13 = vsub.f32 1.5, %v482_v8 }
 0x168   :  { %v1244_v5 = vpop.eup %1243 }
 0x169   :  { %v1763_v0 = vpop.xlane.xlu2 %411  ;;  %v490_v9 = vmul.f32 %v1244_v5, %v1756_v36  ;;  %v484_v28 = vmul.f32 %v1242_v51, %v483_v13  ;;  %vm496_vm0 = vweird.f32 %v1244_v5 }
 0x16a   :  { %1245 = vrsqrt.f32 %v1763_v0  ;;  %vm497_vm8 = vmor %vm495_vm7, %vm496_vm0  ;;  %vm505_vm11 = vweird.f32 %v1763_v0  ;;  %vm438_vm13 = vcmp.gt.f32.partialorder %v1763_v0, 0.0 }
 0x16b   :  { %v491_v14 = vmul.f32 %v1244_v5, %v490_v9  ;;  %v488_v32 = vsel %vm487_vm5, %v1242_v51, %v484_v28 }
 0x16c   :  { %v1782_v62 = vsel %vm436_vm6, %v488_v32, 0.0 }
 0x16d   :  { %v492_v23 = vmul.f32 0.5, %v491_v14 }
 0x16f   :  { %v493_v29 = vsub.f32 1.5, %v492_v23 }
 0x170   :  { %641 = vxpose.xlu1.b32.start [1/16] (narrow) %v1759_v52, 8  ;;  %v1246_v19 = vpop.eup %1245 }
 0x171   :  { %v1770_v16 = vpop.xlane.xlu0 %413  ;;  %v500_v24 = vmul.f32 %v1246_v19, %v1763_v0  ;;  %v494_v38 = vmul.f32 %v1244_v5, %v493_v29  ;;  %vm506_vm10 = vweird.f32 %v1246_v19 }
 0x172   :  { %1247 = vrsqrt.f32 %v1770_v16  ;;  %vm507_vm12 = vmor %vm505_vm11, %vm506_vm10  ;;  %vm515_vm15 = vweird.f32 %v1770_v16  ;;  %vm439_vm2 = vcmp.gt.f32.partialorder %v1770_v16, 0.0 }
 0x173   :  { %v501_v57 = vmul.f32 %v1246_v19, %v500_v24  ;;  %v498_v3 = vsel %vm497_vm8, %v1244_v5, %v494_v38 }
 0x174   :  { %v1791_v41 = vsel %vm437_vm9, %v498_v3, 0.0 }
 0x175   :  { %v502_v34 = vmul.f32 0.5, %v501_v57 }
 0x177   :  { %v503_v25 = vsub.f32 1.5, %v502_v34 }
 0x178   :  { %642 = vxpose.xlu1.b32.cont [2/16] (narrow) %v1766_v6, 8  ;;  %v1248_v58 = vpop.eup %1247 }
 0x179   :  { %v1778_v31 = vpop.xlane.xlu1 %415  ;;  %v510_v37 = vmul.f32 %v1248_v58, %v1770_v16  ;;  %v504_v43 = vmul.f32 %v1246_v19, %v503_v25  ;;  %vm516_vm14 = vweird.f32 %v1248_v58 }
 0x17a   :  { %1249 = vrsqrt.f32 %v1778_v31  ;;  %vm517_vm1 = vmor %vm515_vm15, %vm516_vm14  ;;  %vm525_vm4 = vweird.f32 %v1778_v31  ;;  %vm440_vm6 = vcmp.gt.f32.partialorder %v1778_v31, 0.0 }
 0x17b   :  { %v511_v15 = vmul.f32 %v1248_v58, %v510_v37  ;;  %v508_v49 = vsel %vm507_vm12, %v1246_v19, %v504_v43 }
 0x17c   :  { %v1800_v27 = vsel %vm438_vm13, %v508_v49, 0.0 }
 0x17d   :  { %v512_v54 = vmul.f32 0.5, %v511_v15 }
 0x17f   :  { %v513_v45 = vsub.f32 1.5, %v512_v54 }
 0x180   :  { %643 = vxpose.xlu1.b32.cont [3/16] (narrow) %v1773_v21, 8  ;;  %v1250_v40 = vpop.eup %1249 }
 0x181   :  { %v1787_v39 = vpop.xlane.xlu2 %417  ;;  %v520_v42 = vmul.f32 %v1250_v40, %v1778_v31  ;;  %v514_v55 = vmul.f32 %v1248_v58, %v513_v45  ;;  %vm526_vm3 = vweird.f32 %v1250_v40 }
 0x182   :  { %1251 = vrsqrt.f32 %v1787_v39  ;;  %vm527_vm5 = vmor %vm525_vm4, %vm526_vm3  ;;  %vm535_vm7 = vweird.f32 %v1787_v39  ;;  %vm441_vm9 = vcmp.gt.f32.partialorder %v1787_v39, 0.0 }
 0x183   :  { %v521_v47 = vmul.f32 %v1250_v40, %v520_v42  ;;  %v518_v63 = vsel %vm517_vm1, %v1248_v58, %v514_v55 }
 0x184   :  { %v1809_v4 = vsel %vm439_vm2, %v518_v63, 0.0 }
 0x185   :  { %v522_v50 = vmul.f32 0.5, %v521_v47 }
 0x187   :  { %v523_v59 = vsub.f32 1.5, %v522_v50 }
 0x188   :  { %644 = vxpose.xlu1.b32.cont [4/16] (narrow) %v1782_v62, 8  ;;  %v1252_v36 = vpop.eup %1251 }
 0x189   :  { %v1796_v48 = vpop.xlane.xlu0 %419  ;;  %v530_v51 = vmul.f32 %v1252_v36, %v1787_v39  ;;  %v524_v9 = vmul.f32 %v1250_v40, %v523_v59  ;;  %vm536_vm0 = vweird.f32 %v1252_v36 }
 0x18a   :  { %1253 = vrsqrt.f32 %v1796_v48  ;;  %vm537_vm8 = vmor %vm535_vm7, %vm536_vm0  ;;  %vm545_vm11 = vweird.f32 %v1796_v48  ;;  %vm442_vm13 = vcmp.gt.f32.partialorder %v1796_v48, 0.0 }
 0x18b   :  { %v531_v60 = vmul.f32 %v1252_v36, %v530_v51  ;;  %v528_v17 = vsel %vm527_vm5, %v1250_v40, %v524_v9 }
 0x18c   :  { %v1818_v19 = vsel %vm440_vm6, %v528_v17, 0.0 }
 0x18d   :  { %v532_v5 = vmul.f32 0.5, %v531_v60 }
 0x18f   :  { %v533_v11 = vsub.f32 1.5, %v532_v5 }
 0x190   :  { %645 = vxpose.xlu1.b32.cont [5/16] (narrow) %v1791_v41, 8  ;;  %v1254_v0 = vpop.eup %1253 }
 0x191   :  { %v1805_v61 = vpop.xlane.xlu1 %421  ;;  %v540_v8 = vmul.f32 %v1254_v0, %v1796_v48  ;;  %v534_v28 = vmul.f32 %v1252_v36, %v533_v11  ;;  %vm546_vm10 = vweird.f32 %v1254_v0 }
 0x192   :  { %1255 = vrsqrt.f32 %v1805_v61  ;;  %vm547_vm12 = vmor %vm545_vm11, %vm546_vm10  ;;  %vm555_vm15 = vweird.f32 %v1805_v61  ;;  %vm443_vm2 = vcmp.gt.f32.partialorder %v1805_v61, 0.0 }
 0x193   :  { %v541_v13 = vmul.f32 %v1254_v0, %v540_v8  ;;  %v538_v58 = vsel %vm537_vm8, %v1252_v36, %v534_v28 }
 0x194   :  { %v1827_v34 = vsel %vm441_vm9, %v538_v58, 0.0 }
 0x195   :  { %v542_v23 = vmul.f32 0.5, %v541_v13  ;;  %v1841_v49 = vpop.f32.mrf.mxu1 }
 0x197   :  { %v543_v29 = vsub.f32 1.5, %v542_v23 }
 0x198   :  { %646 = vxpose.xlu1.b32.cont [6/16] (narrow) %v1800_v27, 8  ;;  %v1256_v16 = vpop.eup %1255 }
 0x199   :  { %v1814_v14 = vpop.xlane.xlu2 %423  ;;  %v550_v24 = vmul.f32 %v1256_v16, %v1805_v61  ;;  %v544_v25 = vmul.f32 %v1254_v0, %v543_v29  ;;  %vm556_vm14 = vweird.f32 %v1256_v16 }
 0x19a   :  { %1257 = vrsqrt.f32 %v1814_v14  ;;  %vm557_vm1 = vmor %vm555_vm15, %vm556_vm14  ;;  %vm565_vm4 = vweird.f32 %v1814_v14  ;;  %vm444_vm6 = vcmp.gt.f32.partialorder %v1814_v14, 0.0 }
 0x19b   :  { %v551_v57 = vmul.f32 %v1256_v16, %v550_v24  ;;  %v548_v54 = vsel %vm547_vm12, %v1254_v0, %v544_v25 }
 0x19c   :  { %v1836_v42 = vsel %vm442_vm13, %v548_v54, 0.0 }
 0x19d   :  { %v552_v37 = vmul.f32 0.5, %v551_v57  ;;  %v799_v5 = vpop.f32.mrf.mxu1 }
 0x19f   :  { %v553_v15 = vsub.f32 1.5, %v552_v37 }
 0x1a0   :  { %647 = vxpose.xlu1.b32.cont [7/16] (narrow) %v1809_v4, 8  ;;  %v1258_v31 = vpop.eup %1257 }
 0x1a1   :  { %v1823_v32 = vpop.xlane.xlu0 %425  ;;  %v560_v38 = vmul.f32 %v1258_v31, %v1814_v14  ;;  %v554_v47 = vmul.f32 %v1256_v16, %v553_v15  ;;  %vm566_vm3 = vweird.f32 %v1258_v31 }
 0x1a2   :  { %1259 = vrsqrt.f32 %v1823_v32  ;;  %vm567_vm5 = vmor %vm565_vm4, %vm566_vm3  ;;  %vm575_vm7 = vweird.f32 %v1823_v32  ;;  %vm445_vm9 = vcmp.gt.f32.partialorder %v1823_v32, 0.0 }
 0x1a3   :  { %v561_v3 = vmul.f32 %v1258_v31, %v560_v38  ;;  %v558_v48 = vsel %vm557_vm1, %v1256_v16, %v554_v47 }
 0x1a4   :  { %v1847_v59 = vsel %vm443_vm2, %v558_v48, 0.0 }
 0x1a5   :  { %v562_v43 = vmul.f32 0.5, %v561_v3 }
 0x1a7   :  { %v563_v36 = vsub.f32 1.5, %v562_v43 }
 0x1a8   :  { %648 = vxpose.xlu1.b32.cont [8/16] (narrow) %v1818_v19, 8  ;;  %v1260_v39 = vpop.eup %1259 }
 0x1a9   :  { %v1832_v40 = vpop.xlane.xlu1 %427  ;;  %v570_v45 = vmul.f32 %v1260_v39, %v1823_v32  ;;  %v564_v0 = vmul.f32 %v1258_v31, %v563_v36  ;;  %vm576_vm0 = vweird.f32 %v1260_v39 }
 0x1aa   :  { %1261 = vrsqrt.f32 %v1832_v40  ;;  %vm577_vm8 = vmor %vm575_vm7, %vm576_vm0  ;;  %vm585_vm11 = vweird.f32 %v1832_v40  ;;  %vm446_vm15 = vcmp.gt.f32.partialorder %v1832_v40, 0.0  ;;  %vm929_vm0 = vcmask 261120  }
 0x1ab   :  { %v571_v50 = vmul.f32 %v1260_v39, %v570_v45  ;;  %v568_v13 = vsel %vm567_vm5, %v1258_v31, %v564_v0  ;;  %vm1112_vm7 = vcmask 64512  }
 0x1ac   :  { %v1853_v17 = vsel %vm444_vm6, %v568_v13, 0.0 }
 0x1ad   :  { %v572_v60 = vmul.f32 0.5, %v571_v50 }
 0x1af   :  { %v573_v8 = vsub.f32 1.5, %v572_v60 }
 0x1b0   :  { %649 = vxpose.xlu1.b32.cont [9/16] (narrow) %v1827_v34, 8  ;;  %v1262_v55 = vpop.eup %1261  ;;  %v802_v58 = vpop.f32.mrf.mxu1 }
 0x1b1   :  { %v1843_v51 = vpop.xlane.xlu2 %429  ;;  %v580_v63 = vmul.f32 %v1262_v55, %v1832_v40  ;;  %v574_v24 = vmul.f32 %v1260_v39, %v573_v8  ;;  %vm586_vm10 = vweird.f32 %v1262_v55  ;;  %v627_v8 = vmul.f32 %v1773_v21, %v1588_v18 }
 0x1b2   :  { %1263 = vrsqrt.f32 %v1843_v51  ;;  %vm587_vm12 = vmor %vm585_vm11, %vm586_vm10  ;;  %vm595_vm13 = vweird.f32 %v1843_v51  ;;  %vm447_vm2 = vcmp.gt.f32.partialorder %v1843_v51, 0.0 }
 0x1b3   :  { %v581_v9 = vmul.f32 %v1262_v55, %v580_v63  ;;  %v578_v57 = vsel %vm577_vm8, %v1260_v39, %v574_v24  ;;  %v625_v63 = vmul.f32 %v1759_v52, %v1570_v2  ;;  %v633_v2 = vmul.f32 %v1827_v34, %v1652_v12 }
 0x1b4   :  { %v1859_v14 = vsel %vm445_vm9, %v578_v57, 0.0  ;;  %v629_v12 = vmul.f32 %v1791_v41, %v1608_v35  ;;  %v636_v35 = vmul.f32 %v1853_v17, %v1685_v46 }
 0x1b5   :  { %v582_v16 = vmul.f32 0.5, %v581_v9 }
 0x1b7   :  { %v583_v28 = vsub.f32 1.5, %v582_v16 }
 0x1b8   :  { %650 = vxpose.xlu1.b32.cont [10/16] (narrow) %v1836_v42, 8  ;;  %v1264_v61 = vpop.eup %1263  ;;  %v805_v43 = vpop.f32.mrf.mxu1 }
 0x1b9   :  { %v432_v11 = vpop.xlane.xlu0 %431  ;;  %v590_v23 = vmul.f32 %v1264_v61, %v1843_v51  ;;  %v584_v25 = vmul.f32 %v1262_v55, %v583_v28  ;;  %856 = vmatpush.msrb.mxu0 %v805_v43  ;;  %1222 = vmatpush.msra.mxu3 %v805_v43  ;;  %vm596_vm14 = vweird.f32 %v1264_v61  ;;  %v631_v51 = vmul.f32 %v1809_v4, %v1630_v53 }
 0x1ba   :  { %1265 = vrsqrt.f32 %v432_v11  ;;  %vm597_vm1 = vmor %vm595_vm13, %vm596_vm14  ;;  %vm605_vm3 = vweird.f32 %v432_v11  ;;  %vm448_vm6 = vcmp.gt.f32.partialorder %v432_v11, 0.0  ;;  %v628_v53 = vmul.f32 %v1782_v62, %v1597_v26 }
 0x1bb   :  { %v591_v29 = vmul.f32 %v1264_v61, %v590_v23  ;;  %v588_v54 = vsel %vm587_vm12, %v1262_v55, %v584_v25  ;;  %857 = vmatpush.msrb.mxu0 %v802_v58  ;;  %1223 = vmatpush.msra.mxu3 %v802_v58 }
 0x1bc   :  { %v622_v32 = vsel %vm446_vm15, %v588_v54, 0.0 }
 0x1bd   :  { %v592_v37 = vmul.f32 0.5, %v591_v29  ;;  %858 = vmatpush.msrb.mxu0 %v799_v5  ;;  %1224 = vmatpush.msra.mxu3 %v799_v5  ;;  %v632_v5 = vmul.f32 %v1818_v19, %v1641_v1  ;;  %v634_v1 = vmul.f32 %v1836_v42, %v1663_v22  ;;  %v630_v22 = vmul.f32 %v1800_v27, %v1619_v44  ;;  %v927_v42 = vld [vmem:[%s2082_s4 + $0x10] sm:$0xff] }
 0x1be   :  { %v638_v44 = vmul.f32 %v622_v32, %v1703_v7 }
 0x1bf   :  { %v593_v15 = vsub.f32 1.5, %v592_v37  ;;  %859 = vmatpush.msrb.mxu0 %v1841_v49  ;;  %1225 = vmatpush.msra.mxu3 %v1841_v49  ;;  %v626_v49 = vmul.f32 %v1766_v6, %v1579_v10  ;;  %v635_v6 = vmul.f32 %v1847_v59, %v1674_v33  ;;  %v637_v33 = vmul.f32 %v1859_v14, %v1694_v56 }
 0x1c0   :  { %651 = vxpose.xlu1.b32.cont [11/16] (narrow) %v1847_v59, 8  ;;  %v1266_v31 = vpop.eup %1265  ;;  %v926_v59 = vld [vmem:[%s2082_s4 + $0x8] sm:$0xff] }
 0x1c1   :  { %v600_v38 = vmul.f32 %v1266_v31, %v432_v11  ;;  %v594_v45 = vmul.f32 %v1264_v61, %v593_v15  ;;  %vm606_vm4 = vweird.f32 %v1266_v31 }
 0x1c2   :  { %vm607_vm5 = vmor %vm605_vm3, %vm606_vm4 }
 0x1c3   :  { %v601_v3 = vmul.f32 %v1266_v31, %v600_v38  ;;  %v598_v36 = vsel %vm597_vm1, %v1264_v61, %v594_v45  ;;  %v925_v61 = vld [vmem:[%s2082_s4] sm:$0xff] }
 0x1c4   :  { %v623_v40 = vsel %vm447_vm2, %v598_v36, 0.0 }
 0x1c5   :  { %v602_v39 = vmul.f32 0.5, %v601_v3  ;;  %v639_v19 = vmul.f32 %v623_v40, %v1712_v20 }
 0x1c7   :  { %v603_v47 = vsub.f32 1.5, %v602_v39 }
 0x1c8   :  { %652 = vxpose.xlu1.b32.cont [12/16] (narrow) %v1853_v17, 8 }
 0x1c9   :  { %v604_v50 = vmul.f32 %v1266_v31, %v603_v47 }
 0x1cb   :  { %v608_v48 = vsel %vm607_vm5, %v1266_v31, %v604_v50 }
 0x1cc   :  { %v624_v55 = vsel %vm448_vm6, %v608_v48, 0.0 }
 0x1cd   :  { %v640_v56 = vmul.f32 %v624_v55, %v1722_v30  ;;  %v928_v30 = vld [vmem:[%s2082_s4 + $0x18] sm:$0xff] }
 0x1ce   :  { %990 = vmatpush.msrb.mxu2 %v928_v30 }
 0x1d0   :  { %653 = vxpose.xlu1.b32.cont [13/16] (narrow) %v1859_v14, 8  ;;  %991 = vmatpush.msrb.mxu2 %v927_v42 }
 0x1d2   :  { %992 = vmatpush.msrb.mxu2 %v926_v59 }
 0x1d4   :  { %993 = vmatpush.msrb.mxu2 %v925_v61 }
 0x1d8   :  { %654 = vxpose.xlu1.b32.cont [14/16] (narrow) %v622_v32, 8 }
 0x1e0   :  { %655 = vxpose.xlu1.b32.cont [15/16] (narrow) %v623_v40, 8 }
 0x1e8   :  { %656 = vxpose.xlu1.b32.end [16/16] (narrow) %v624_v55, 8 }
 0x214   :  { %v657_v60 = vpop.trf.xlu1 }
 0x215   :  { %v673_v0 = vperm.slane %v657_v60, 0 }
 0x217   :  { %v1878_v9 = vmul.f32 %v673_v0, %v625_v63  ;;  %v1880_v11 = vmul.f32 %v673_v0, %v631_v51  ;;  %v1882_v13 = vmul.f32 %v673_v0, %v626_v49  ;;  %v1886_v10 = vmul.f32 %v673_v0, %v632_v5 }
 0x218   :  { %v1893_v18 = vmul.f32 %v673_v0, %v627_v8  ;;  %v1898_v52 = vmul.f32 %v673_v0, %v633_v2  ;;  %v1903_v26 = vmul.f32 %v673_v0, %v628_v53  ;;  %v1908_v21 = vmul.f32 %v673_v0, %v634_v1 }
 0x219   :  { %690 = vst [vmem:[#allocation5] sm:$0xff] %v1878_v9  ;;  %860 = vmatmul.f32.vlgmr.msrb.gmra.mxu0 %v1878_v9  ;;  %878 = vmatmul.f32.vlgmr.msra.gmra.mxu3 %v1880_v11  ;;  %v1913_v62 = vmul.f32 %v673_v0, %v629_v12  ;;  %v1918_v41 = vmul.f32 %v673_v0, %v635_v6 }
 0x21a   :  { %696 = vst [vmem:[#allocation5 + $0x30] sm:$0xff] %v1880_v11  ;;  %v1923_v4 = vmul.f32 %v673_v0, %v630_v22  ;;  %v1927_v27 = vmul.f32 %v673_v0, %v636_v35  ;;  %v1933_v46 = vmul.f32 %v673_v0, %v637_v33  ;;  %v1937_v34 = vmul.f32 %v673_v0, %v638_v44 }
 0x21b   :  { %691 = vst [vmem:[#allocation5 + $0x8] sm:$0xff] %v1882_v13  ;;  %v1940_v7 = vmul.f32 %v673_v0, %v639_v19  ;;  %v1943_v20 = vmul.f32 %v673_v0, %v640_v56 }
 0x21c   :  { %697 = vst [vmem:[#allocation5 + $0x38] sm:$0xff] %v1886_v10 }
 0x21d   :  { %692 = vst [vmem:[#allocation5 + $0x10] sm:$0xff] %v1893_v18 }
 0x21e   :  { %698 = vst [vmem:[#allocation5 + $0x40] sm:$0xff] %v1898_v52 }
 0x21f   :  { %693 = vst [vmem:[#allocation5 + $0x18] sm:$0xff] %v1903_v26 }
 0x220   :  { %699 = vst [vmem:[#allocation5 + $0x48] sm:$0xff] %v1908_v21 }
 0x221   :  { %863 = vmatmul.f32.gmra.mxu0 %v1882_v13  ;;  %881 = vmatmul.f32.gmra.mxu3 %v1886_v10  ;;  %694 = vst [vmem:[#allocation5 + $0x20] sm:$0xff] %v1913_v62 }
 0x222   :  { %700 = vst [vmem:[#allocation5 + $0x50] sm:$0xff] %v1918_v41 }
 0x223   :  { %695 = vst [vmem:[#allocation5 + $0x28] sm:$0xff] %v1923_v4 }
 0x224   :  { %701 = vst [vmem:[#allocation5 + $0x58] sm:$0xff] %v1927_v27 }
 0x225   :  { %702 = vst [vmem:[#allocation5 + $0x60] sm:$0xff] %v1933_v46 }
 0x226   :  { %703 = vst [vmem:[#allocation5 + $0x68] sm:$0xff] %v1937_v34 }
 0x227   :  { %704 = vst [vmem:[#allocation5 + $0x70] sm:$0xff] %v1940_v7 }
 0x228   :  { %705 = vst [vmem:[#allocation5 + $0x78] sm:$0xff] %v1943_v20 }
 0x229   :  { %866 = vmatmul.f32.gmra.mxu0 %v1893_v18  ;;  %884 = vmatmul.f32.gmra.mxu3 %v1898_v52  ;;  %1143 = dma.vmem_to_hbm [thread:$0]  %s1136_s28, 2048, %s1138_s26, [#allocation4], %s1350_s3, %s1350_s3, %s1351_s9  }
 0x231   :  { %869 = vmatmul.f32.gmra.mxu0 %v1903_v26  ;;  %887 = vmatmul.f32.gmra.mxu3 %v1908_v21 }
 0x239   :  { %872 = vmatmul.f32.gmra.mxu0 %v1913_v62  ;;  %890 = vmatmul.f32.gmra.mxu3 %v1918_v41 }
 0x241   :  { %875 = vmatmul.f32.gmra.mxu0 %v1923_v4  ;;  %893 = vmatmul.f32.gmra.mxu3 %v1927_v27 }
 0x249   :  { %896 = vmatmul.f32.gmra.mxu3 %v1933_v46 }
 0x251   :  { %899 = vmatmul.f32.gmra.mxu3 %v1937_v34 }
 0x259   :  { %902 = vmatmul.f32.gmra.mxu3 %v1940_v7 }
 0x261   :  { %905 = vmatmul.f32.gmra.mxu3 %v1943_v20 }
 0x296   :  { %v861_v17 = vpop.f32.mrf.mxu0 }
 0x297   :  { %v909_v16 = vmax.f32 %v861_v17, 0.0 }
 0x299   :  { %1186 = vmatmul.msk.f32.vlgmr.msrb.gmra.mxu2 %vm929_vm0, %v909_v16 }
 0x29c   :  { %v879_v31 = vpop.f32.mrf.mxu3 }
 0x29d   :  { %v915_v54 = vmax.f32 %v879_v31, 0.0 }
 0x29e   :  { %v864_v23 = vpop.f32.mrf.mxu0 }
 0x29f   :  { %v910_v24 = vmax.f32 %v864_v23, 0.0 }
 0x2a1   :  { %1187 = vmatmul.msk.f32.gmra.mxu2 %vm929_vm0, %v910_v24 }
 0x2a4   :  { %v882_v38 = vpop.f32.mrf.mxu3 }
 0x2a5   :  { %v916_v43 = vmax.f32 %v882_v38, 0.0 }
 0x2a6   :  { %v867_v28 = vpop.f32.mrf.mxu0 }
 0x2a7   :  { %v911_v29 = vmax.f32 %v867_v28, 0.0 }
 0x2a9   :  { %1188 = vmatmul.msk.f32.gmra.mxu2 %vm929_vm0, %v911_v29 }
 0x2ac   :  { %v885_v3 = vpop.f32.mrf.mxu3 }
 0x2ad   :  { %v917_v39 = vmax.f32 %v885_v3, 0.0 }
 0x2ae   :  { %v870_v57 = vpop.f32.mrf.mxu0 }
 0x2af   :  { %v912_v58 = vmax.f32 %v870_v57, 0.0 }
 0x2b1   :  { %1189 = vmatmul.msk.f32.gmra.mxu2 %vm929_vm0, %v912_v58 }
 0x2b4   :  { %v888_v32 = vpop.f32.mrf.mxu3 }
 0x2b5   :  { %v918_v47 = vmax.f32 %v888_v32, 0.0 }
 0x2b6   :  { %v873_v14 = vpop.f32.mrf.mxu0 }
 0x2b7   :  { %v913_v37 = vmax.f32 %v873_v14, 0.0 }
 0x2b9   :  { %1190 = vmatmul.msk.f32.gmra.mxu2 %vm929_vm0, %v913_v37 }
 0x2bc   :  { %v891_v45 = vpop.f32.mrf.mxu3 }
 0x2bd   :  { %v919_v40 = vmax.f32 %v891_v45, 0.0 }
 0x2be   :  { %v876_v25 = vpop.f32.mrf.mxu0 }
 0x2bf   :  { %v914_v15 = vmax.f32 %v876_v25, 0.0 }
 0x2c1   :  { %1191 = vmatmul.msk.f32.gmra.mxu2 %vm929_vm0, %v914_v15 }
 0x2c4   :  { %v894_v36 = vpop.f32.mrf.mxu3 }
 0x2c5   :  { %v920_v48 = vmax.f32 %v894_v36, 0.0 }
 0x2c9   :  { %1192 = vmatmul.msk.f32.gmra.mxu2 %vm929_vm0, %v915_v54 }
 0x2cc   :  { %v897_v50 = vpop.f32.mrf.mxu3 }
 0x2cd   :  { %v921_v55 = vmax.f32 %v897_v50, 0.0 }
 0x2d1   :  { %1193 = vmatmul.msk.f32.gmra.mxu2 %vm929_vm0, %v916_v43 }
 0x2d4   :  { %v900_v60 = vpop.f32.mrf.mxu3 }
 0x2d5   :  { %v922_v63 = vmax.f32 %v900_v60, 0.0 }
 0x2d9   :  { %1194 = vmatmul.msk.f32.gmra.mxu2 %vm929_vm0, %v917_v39 }
 0x2dc   :  { %v903_v49 = vpop.f32.mrf.mxu3 }
 0x2dd   :  { %v923_v51 = vmax.f32 %v903_v49, 0.0 }
 0x2e1   :  { %1195 = vmatmul.msk.f32.gmra.mxu2 %vm929_vm0, %v918_v47 }
 0x2e4   :  { %v906_v0 = vpop.f32.mrf.mxu3 }
 0x2e5   :  { %v924_v5 = vmax.f32 %v906_v0, 0.0 }
 0x2e9   :  { %1196 = vmatmul.msk.f32.gmra.mxu2 %vm929_vm0, %v919_v40 }
 0x2f1   :  { %1197 = vmatmul.msk.f32.gmra.mxu2 %vm929_vm0, %v920_v48 }
 0x2f9   :  { %1198 = vmatmul.msk.f32.gmra.mxu2 %vm929_vm0, %v921_v55 }
 0x301   :  { %1199 = vmatmul.msk.f32.gmra.mxu2 %vm929_vm0, %v922_v63 }
 0x309   :  { %1200 = vmatmul.msk.f32.gmra.mxu2 %vm929_vm0, %v923_v51 }
 0x311   :  { %1201 = vmatmul.msk.f32.gmra.mxu2 %vm929_vm0, %v924_v5 }
 0x31c   :  { %v995_v8 = vpop.f32.mrf.mxu2 }
 0x324   :  { %v998_v2 = vpop.f32.mrf.mxu2 }
 0x32c   :  { %v1001_v53 = vpop.f32.mrf.mxu2 }
 0x334   :  { %v1004_v1 = vpop.f32.mrf.mxu2 }
 0x33c   :  { %v1007_v12 = vpop.f32.mrf.mxu2 }
 0x344   :  { %v1010_v6 = vpop.f32.mrf.mxu2 }
 0x34c   :  { %v1013_v22 = vpop.f32.mrf.mxu2 }
 0x354   :  { %v1016_v35 = vpop.f32.mrf.mxu2 }
 0x35c   :  { %v1019_v33 = vpop.f32.mrf.mxu2 }
 0x364   :  { %v1022_v44 = vpop.f32.mrf.mxu2 }
 0x36c   :  { %v1025_v19 = vpop.f32.mrf.mxu2 }
 0x374   :  { %v1028_v56 = vpop.f32.mrf.mxu2 }
 0x37c   :  { %v1031_v30 = vpop.f32.mrf.mxu2 }
 0x384   :  { %v1034_v42 = vpop.f32.mrf.mxu2 }
 0x38c   :  { %v1037_v59 = vpop.f32.mrf.mxu2 }
 0x394   :  { %v1040_v61 = vpop.f32.mrf.mxu2 }
 0x395   :  { %1047 = vmatpush.msrb.mxu3 %v1040_v61 }
 0x397   :  { %1048 = vmatpush.msrb.mxu3 %v1037_v59 }
 0x399   :  { %1049 = vmatpush.msrb.mxu3 %v1034_v42 }
 0x39b   :  { %1050 = vmatpush.msrb.mxu3 %v1031_v30 }
 0x39d   :  { %1051 = vmatpush.msrb.mxu3 %v1028_v56 }
 0x39f   :  { %1052 = vmatpush.msrb.mxu3 %v1025_v19 }
 0x3a1   :  { %1053 = vmatpush.msrb.mxu3 %v1022_v44 }
 0x3a3   :  { %1054 = vmatpush.msrb.mxu3 %v1019_v33 }
 0x3a5   :  { %1055 = vmatpush.msrb.mxu3 %v1016_v35 }
 0x3a7   :  { %1056 = vmatpush.msrb.mxu3 %v1013_v22 }
 0x3a9   :  { %1057 = vmatpush.msrb.mxu3 %v1010_v6 }
 0x3ab   :  { %1058 = vmatpush.msrb.mxu3 %v1007_v12 }
 0x3ad   :  { %1059 = vmatpush.msrb.mxu3 %v1004_v1 }
 0x3af   :  { %1060 = vmatpush.msrb.mxu3 %v1001_v53 }
 0x3b1   :  { %1061 = vmatpush.msrb.mxu3 %v998_v2 }
 0x3b3   :  { %1062 = vmatpush.msrb.mxu3 %v995_v8 }
 0x3b4   :  { %1063 = vmatmul.f32.vlgmr.msrb.gmra.mxu3 %v1878_v9  ;;  %v1234_v9 = vld [vmem:[%s2083_s5] ss:$0 sm:$0xff] }
 0x3bc   :  { %1066 = vmatmul.f32.gmra.mxu3 %v1882_v13 }
 0x3c4   :  { %1069 = vmatmul.f32.gmra.mxu3 %v1893_v18 }
 0x3cc   :  { %1072 = vmatmul.f32.gmra.mxu3 %v1903_v26 }
 0x3d4   :  { %1075 = vmatmul.f32.gmra.mxu3 %v1913_v62 }
 0x3dc   :  { %1078 = vmatmul.f32.gmra.mxu3 %v1923_v4 }
 0x3e4   :  { %1081 = vmatmul.f32.gmra.mxu3 %v1880_v11 }
 0x3ec   :  { %1084 = vmatmul.f32.gmra.mxu3 %v1886_v10 }
 0x3f4   :  { %1087 = vmatmul.f32.gmra.mxu3 %v1898_v52 }
 0x3fc   :  { %1090 = vmatmul.f32.gmra.mxu3 %v1908_v21 }
 0x404   :  { %1093 = vmatmul.f32.gmra.mxu3 %v1918_v41 }
 0x40c   :  { %1096 = vmatmul.f32.gmra.mxu3 %v1927_v27 }
 0x414   :  { %1099 = vmatmul.f32.gmra.mxu3 %v1933_v46 }
 0x41c   :  { %1102 = vmatmul.f32.gmra.mxu3 %v1937_v34 }
 0x424   :  { %1105 = vmatmul.f32.gmra.mxu3 %v1940_v7 }
 0x42c   :  { %1108 = vmatmul.f32.gmra.mxu3 %v1943_v20 }
 0x437   :  { %v1064_v11 = vpop.f32.mrf.mxu3 }
 0x438   :  { %v1065_v13 = vadd.f32 %v1234_v9, %v1064_v11 }
 0x43a   :  { %1113 = vst.msk [vmem:[%s2084_s6] sm:$0xff] %vm1112_vm7, %v1065_v13 }
 0x43f   :  { %v1067_v10 = vpop.f32.mrf.mxu3 }
 0x440   :  { %v1068_v18 = vadd.f32 %v1234_v9, %v1067_v10 }
 0x442   :  { %1114 = vst.msk [vmem:[%s2084_s6 + $0x8] sm:$0xff] %vm1112_vm7, %v1068_v18 }
 0x447   :  { %v1070_v52 = vpop.f32.mrf.mxu3 }
 0x448   :  { %v1071_v26 = vadd.f32 %v1234_v9, %v1070_v52 }
 0x44a   :  { %1115 = vst.msk [vmem:[%s2084_s6 + $0x10] sm:$0xff] %vm1112_vm7, %v1071_v26 }
 0x44f   :  { %v1073_v21 = vpop.f32.mrf.mxu3 }
 0x450   :  { %v1074_v62 = vadd.f32 %v1234_v9, %v1073_v21 }
 0x452   :  { %1116 = vst.msk [vmem:[%s2084_s6 + $0x18] sm:$0xff] %vm1112_vm7, %v1074_v62 }
 0x457   :  { %v1076_v41 = vpop.f32.mrf.mxu3 }
 0x458   :  { %v1077_v4 = vadd.f32 %v1234_v9, %v1076_v41 }
 0x45a   :  { %1117 = vst.msk [vmem:[%s2084_s6 + $0x20] sm:$0xff] %vm1112_vm7, %v1077_v4 }
 0x45f   :  { %v1079_v27 = vpop.f32.mrf.mxu3 }
 0x460   :  { %v1080_v46 = vadd.f32 %v1234_v9, %v1079_v27 }
 0x462   :  { %1118 = vst.msk [vmem:[%s2084_s6 + $0x28] sm:$0xff] %vm1112_vm7, %v1080_v46 }
 0x467   :  { %v1082_v34 = vpop.f32.mrf.mxu3 }
 0x468   :  { %v1083_v7 = vadd.f32 %v1234_v9, %v1082_v34 }
 0x46a   :  { %1119 = vst.msk [vmem:[%s2084_s6 + $0x30] sm:$0xff] %vm1112_vm7, %v1083_v7 }
 0x46f   :  { %v1085_v20 = vpop.f32.mrf.mxu3 }
 0x470   :  { %v1086_v17 = vadd.f32 %v1234_v9, %v1085_v20 }
 0x472   :  { %1120 = vst.msk [vmem:[%s2084_s6 + $0x38] sm:$0xff] %vm1112_vm7, %v1086_v17 }
 0x477   :  { %v1088_v16 = vpop.f32.mrf.mxu3 }
 0x478   :  { %v1089_v23 = vadd.f32 %v1234_v9, %v1088_v16 }
 0x47a   :  { %1121 = vst.msk [vmem:[%s2084_s6 + $0x40] sm:$0xff] %vm1112_vm7, %v1089_v23 }
 0x47f   :  { %v1091_v24 = vpop.f32.mrf.mxu3 }
 0x480   :  { %v1092_v28 = vadd.f32 %v1234_v9, %v1091_v24 }
 0x482   :  { %1122 = vst.msk [vmem:[%s2084_s6 + $0x48] sm:$0xff] %vm1112_vm7, %v1092_v28 }
 0x487   :  { %v1094_v29 = vpop.f32.mrf.mxu3 }
 0x488   :  { %v1095_v57 = vadd.f32 %v1234_v9, %v1094_v29 }
 0x48a   :  { %1123 = vst.msk [vmem:[%s2084_s6 + $0x50] sm:$0xff] %vm1112_vm7, %v1095_v57 }
 0x48f   :  { %v1097_v58 = vpop.f32.mrf.mxu3 }
 0x490   :  { %v1098_v31 = vadd.f32 %v1234_v9, %v1097_v58 }
 0x492   :  { %1124 = vst.msk [vmem:[%s2084_s6 + $0x58] sm:$0xff] %vm1112_vm7, %v1098_v31 }
 0x497   :  { %v1100_v14 = vpop.f32.mrf.mxu3 }
 0x498   :  { %v1101_v37 = vadd.f32 %v1234_v9, %v1100_v14 }
 0x49a   :  { %1125 = vst.msk [vmem:[%s2084_s6 + $0x60] sm:$0xff] %vm1112_vm7, %v1101_v37 }
 0x49f   :  { %v1103_v38 = vpop.f32.mrf.mxu3 }
 0x4a0   :  { %v1104_v25 = vadd.f32 %v1234_v9, %v1103_v38 }
 0x4a2   :  { %1126 = vst.msk [vmem:[%s2084_s6 + $0x68] sm:$0xff] %vm1112_vm7, %v1104_v25 }
 0x4a7   :  { %v1106_v15 = vpop.f32.mrf.mxu3 }
 0x4a8   :  { %v1107_v3 = vadd.f32 %v1234_v9, %v1106_v15 }
 0x4aa   :  { %1127 = vst.msk [vmem:[%s2084_s6 + $0x70] sm:$0xff] %vm1112_vm7, %v1107_v3 }
 0x4af   :  { %v1109_v54 = vpop.f32.mrf.mxu3 }
 0x4b0   :  { %v1110_v43 = vadd.f32 %v1234_v9, %v1109_v54 }
 0x4b2   :  { %1128 = vst.msk [vmem:[%s2084_s6 + $0x78] sm:$0xff] %vm1112_vm7, %v1110_v43 }
 0x4b3   :  { %1341 = dma.done.wait [#allocation4], 2048  }
 0x4b4   :  { %1342 = vsyncadd [#allocation4], 4294965248 }
 0x4b5   :  { %1343 = dma.done.wait [#allocation7], 2048  }
 0x4b6   :  { %1344 = vsyncadd [#allocation7], 4294965248 }
 0x4b7   :  { %1167 = vsyncpa [#allocation3], 1 }
 0x4b8   :  { %1168 = vsyncpa [#allocation4], 1 }
 0x4b9   :  { %1169 = vsyncpa [#allocation7], 1 }

</bundles_post_ra>
